<compile_context>
chip_gen: v6e
topology: v6e:2x2x1
jax: 0.10.0
libtpu: 0.0.40
codegen_flags: <defaults>
</compile_context>

<pallas_src>
import functools
import math

import jax
import jax.numpy as jnp
from jax.experimental import pallas as pl
from jax.experimental.pallas import tpu as pltpu

# ----------------------------- model hyperparams -----------------------------
VOCAB_SIZE = 64
N_EMBED = 32
N_HEADS = 4
N_LAYERS = 2
BLOCK_SIZE = 8      # max sequence length
BATCH = 2
SEQ = 8
LN_EPS = 1e-5       # torch.nn.LayerNorm default


# ------------------------------ in-kernel helpers ----------------------------
def _layernorm(x, g, b):
    # x: (R, E), g/b: (1, E)
    mu = jnp.mean(x, axis=-1, keepdims=True)
    xc = x - mu
    var = jnp.mean(xc * xc, axis=-1, keepdims=True)
    return xc * jax.lax.rsqrt(var + LN_EPS) * g + b


def _gelu_exact(x):
    # torch nn.GELU() default = exact erf-based GELU
    return 0.5 * x * (1.0 + jax.lax.erf(x * (1.0 / math.sqrt(2.0))))


# ------------------------------ fused forward kernel -------------------------
# Input ref order:
#   tok (R,1) int32, w_embed (V,E), w_pos (P,E),
#   per layer: ln1_g, ln1_b, wqkv (E,3E), bqkv (1,3E), wo (E,E), bo (1,E),
#              ln2_g, ln2_b, w1 (E,4E), b1 (1,4E), w2 (4E,E), b2 (1,E)
#   then: lnf_g, lnf_b, w_out (E,V), b_out (1,V)
# Output ref: logits (R, V)
_PER_LAYER = 12


def fused_transformer_kernel(*refs, n_layers, n_heads, batch, seq):
    tok_ref = refs[0]
    w_embed_ref = refs[1]
    w_pos_ref = refs[2]
    out_ref = refs[-1]
    w = refs[3:-1]

    R = batch * seq
    V, E = w_embed_ref.shape
    P = w_pos_ref.shape[0]
    Dh = E // n_heads
    scale = 1.0 / math.sqrt(Dh)

    # ---- embeddings via one-hot MXU matmuls (no dynamic VMEM indexing) ----
    tok = tok_ref[...]                                              # (R, 1) int32
    vcol = jax.lax.broadcasted_iota(jnp.int32, (R, V), 1)
    tok_oh = (vcol == tok).astype(jnp.float32)                      # (R, V)
    x = jnp.dot(tok_oh, w_embed_ref[...], preferred_element_type=jnp.float32)  # (R, E)

    prow = jax.lax.broadcasted_iota(jnp.int32, (R, P), 0)
    pcol = jax.lax.broadcasted_iota(jnp.int32, (R, P), 1)
    pos_oh = jnp.zeros((R, P), jnp.float32)
    for b in range(batch):                                          # static, tiny
        hit = (prow >= b * seq) & (prow < (b + 1) * seq) & (pcol == prow - b * seq)
        pos_oh = jnp.where(hit, 1.0, pos_oh)
    x = x + jnp.dot(pos_oh, w_pos_ref[...], preferred_element_type=jnp.float32)
    # dropout is identity (eval mode)

    # Combined causal + same-batch mask over folded rows (built once, reused by all layers).
    row = jax.lax.broadcasted_iota(jnp.int32, (R, R), 0)
    col = jax.lax.broadcasted_iota(jnp.int32, (R, R), 1)
    same_batch = jnp.zeros((R, R), dtype=jnp.bool_)
    for b in range(batch):                                          # static: no vector int div
        in_row = (row >= b * seq) & (row < (b + 1) * seq)
        in_col = (col >= b * seq) & (col < (b + 1) * seq)
        same_batch = same_batch | (in_row & in_col)
    mask = same_batch & (col <= row)

    idx = 0
    for _ in range(n_layers):
        (ln1_g, ln1_b, wqkv, bqkv, wo, bo,
         ln2_g, ln2_b, w1, b1, w2, b2) = w[idx:idx + _PER_LAYER]
        idx += _PER_LAYER

        # ---- attention sublayer: x + Attn(LN1(x)) ----
        h = _layernorm(x, ln1_g[...], ln1_b[...])
        qkv = jnp.dot(h, wqkv[...], preferred_element_type=jnp.float32) + bqkv[...]  # (R, 3E)
        wo_v = wo[...]                                                               # (E, E)

        attn = None
        for hd in range(n_heads):
            lo = hd * Dh
            q = qkv[:, lo:lo + Dh]                       # (R, Dh)
            k = qkv[:, E + lo:E + lo + Dh]               # (R, Dh)
            v = qkv[:, 2 * E + lo:2 * E + lo + Dh]       # (R, Dh)

            s = jax.lax.dot_general(q, k, (((1,), (1,)), ((), ())),
                                    preferred_element_type=jnp.float32) * scale      # (R, R)
            s = jnp.where(mask, s, -1e30)                # finite fill: no inf-inf NaN risk
            m = jnp.max(s, axis=-1, keepdims=True)
            p = jnp.exp(s - m)
            p = p * pl.reciprocal(jnp.sum(p, axis=-1, keepdims=True), approx=True)

            o_h = jnp.dot(p, v, preferred_element_type=jnp.float32)                  # (R, Dh)
            # accumulate straight through W_out's row-block: avoids lane-axis concat
            contrib = jnp.dot(o_h, wo_v[lo:lo + Dh, :],
                              preferred_element_type=jnp.float32)                    # (R, E)
            attn = contrib if attn is None else attn + contrib

        x = x + attn + bo[...]

        # ---- ffn sublayer: x + FFN(LN2(x)) ----
        h2 = _layernorm(x, ln2_g[...], ln2_b[...])
        f = jnp.dot(h2, w1[...], preferred_element_type=jnp.float32) + b1[...]
        f = _gelu_exact(f)
        x = x + jnp.dot(f, w2[...], preferred_element_type=jnp.float32) + b2[...]

    # ---- final layernorm + LM head ----
    lnf_g, lnf_b, w_out, b_out = w[idx:idx + 4]
    hf = _layernorm(x, lnf_g[...], lnf_b[...])
    logits = jnp.dot(hf, w_out[...], preferred_element_type=jnp.float32) + b_out[...]
    out_ref[...] = logits.astype(out_ref.dtype)


# ------------------------------ wrapper ---------------------------------------
_BLOCK_KEYS = ("ln1_g", "ln1_b", "wqkv", "bqkv", "wo", "bo",
               "ln2_g", "ln2_b", "w1", "b1", "w2", "b2")


def _full_spec(shape):
    # Single grid step: every array is one full-shape block resident in VMEM.
    return pl.BlockSpec(shape, lambda i: (0, 0))


def run_fused_transformer(tok2d, weights_flat, batch, seq):
    """tok2d: (B*S, 1) int32 -> logits (B*S, V) float32, one fused pallas_call."""
    R = tok2d.shape[0]
    V = weights_flat[-2].shape[1]
    inputs = [tok2d] + list(weights_flat)
    in_specs = [_full_spec(a.shape) for a in inputs]
    return pl.pallas_call(
        functools.partial(fused_transformer_kernel,
                          n_layers=N_LAYERS, n_heads=N_HEADS, batch=batch, seq=seq),
        out_shape=jax.ShapeDtypeStruct((R, V), jnp.float32),
        grid=(1,),
        in_specs=in_specs,
        out_specs=_full_spec((R, V)),
        compiler_params=pltpu.CompilerParams(dimension_semantics=("arbitrary",)),
    )(*inputs)


# ------------------------------ parameter init --------------------------------
def init_params(key):
    """Deterministic init matching the module's _init_weights: Linear/Embedding
    weights ~ N(0, 0.02), biases = 0, LayerNorm gamma=1 beta=0."""
    n_keys = 2 + N_LAYERS * 6 + 1
    keys = jax.random.split(key, n_keys)
    ki = iter(range(n_keys))

    def nrm(k, shape):
        return 0.02 * jax.random.normal(k, shape, dtype=jnp.float32)

    params = {}
    params["w_embed"] = nrm(keys[next(ki)], (VOCAB_SIZE, N_EMBED))
    params["w_pos"] = nrm(keys[next(ki)], (BLOCK_SIZE, N_EMBED))

    params["blocks"] = []
    for _ in range(N_LAYERS):
        wq = nrm(keys[next(ki)], (N_EMBED, N_EMBED))
        wk = nrm(keys[next(ki)], (N_EMBED, N_EMBED))
        wv = nrm(keys[next(ki)], (N_EMBED, N_EMBED))
        blk = {
            "ln1_g": jnp.ones((1, N_EMBED), jnp.float32),
            "ln1_b": jnp.zeros((1, N_EMBED), jnp.float32),
            "wqkv": jnp.concatenate([wq, wk, wv], axis=1),          # (E, 3E) fused projection
            "bqkv": jnp.zeros((1, 3 * N_EMBED), jnp.float32),
            "wo": nrm(keys[next(ki)], (N_EMBED, N_EMBED)),
            "bo": jnp.zeros((1, N_EMBED), jnp.float32),
            "ln2_g": jnp.ones((1, N_EMBED), jnp.float32),
            "ln2_b": jnp.zeros((1, N_EMBED), jnp.float32),
            "w1": nrm(keys[next(ki)], (N_EMBED, 4 * N_EMBED)),
            "b1": jnp.zeros((1, 4 * N_EMBED), jnp.float32),
            "w2": nrm(keys[next(ki)], (4 * N_EMBED, N_EMBED)),
            "b2": jnp.zeros((1, N_EMBED), jnp.float32),
        }
        params["blocks"].append(blk)

    params["lnf_g"] = jnp.ones((1, N_EMBED), jnp.float32)
    params["lnf_b"] = jnp.zeros((1, N_EMBED), jnp.float32)
    params["w_fc_out"] = nrm(keys[next(ki)], (N_EMBED, VOCAB_SIZE))
    params["b_fc_out"] = jnp.zeros((1, VOCAB_SIZE), jnp.float32)
    return params


# ------------------------------ full forward -----------------------------------
@jax.jit
def transformer_forward(tokens, params):
    """tokens: (B, S) int32 -> logits (B, S, VOCAB_SIZE) float32."""
    B, S = tokens.shape
    tok2d = tokens.reshape(B * S, 1).astype(jnp.int32)   # fold batch into rows

    weights_flat = [params["w_embed"], params["w_pos"]]
    for blk in params["blocks"]:
        weights_flat += [blk[k] for k in _BLOCK_KEYS]
    weights_flat += [params["lnf_g"], params["lnf_b"],
                     params["w_fc_out"], params["b_fc_out"]]

    logits2d = run_fused_transformer(tok2d, weights_flat, batch=B, seq=S)
    return logits2d.reshape(B, S, VOCAB_SIZE)


if __name__ == "__main__":
    key = jax.random.PRNGKey(0)
    pkey, dkey = jax.random.split(key)
    params = init_params(pkey)
    tokens = jax.random.randint(dkey, (BATCH, SEQ), 0, VOCAB_SIZE, dtype=jnp.int32)

    assert SEQ <= BLOCK_SIZE
    logits = transformer_forward(tokens, params)
    logits = jax.block_until_ready(logits)

    assert logits.shape == (BATCH, SEQ, VOCAB_SIZE), logits.shape
    assert bool(jnp.all(jnp.isfinite(logits)))
    print("KERNEL_OK")
</pallas_src>

<mosaic_0001>
module attributes {stable_mosaic.version = 11 : i64} {
  func.func @fused_transformer_kernel(%arg0: i32, %arg1: memref<16x1xi32, #tpu.memory_space<vmem>>, %arg2: memref<64x32xf32, #tpu.memory_space<vmem>>, %arg3: memref<8x32xf32, #tpu.memory_space<vmem>>, %arg4: memref<1x32xf32, #tpu.memory_space<vmem>>, %arg5: memref<1x32xf32, #tpu.memory_space<vmem>>, %arg6: memref<32x96xf32, #tpu.memory_space<vmem>>, %arg7: memref<1x96xf32, #tpu.memory_space<vmem>>, %arg8: memref<32x32xf32, #tpu.memory_space<vmem>>, %arg9: memref<1x32xf32, #tpu.memory_space<vmem>>, %arg10: memref<1x32xf32, #tpu.memory_space<vmem>>, %arg11: memref<1x32xf32, #tpu.memory_space<vmem>>, %arg12: memref<32x128xf32, #tpu.memory_space<vmem>>, %arg13: memref<1x128xf32, #tpu.memory_space<vmem>>, %arg14: memref<128x32xf32, #tpu.memory_space<vmem>>, %arg15: memref<1x32xf32, #tpu.memory_space<vmem>>, %arg16: memref<1x32xf32, #tpu.memory_space<vmem>>, %arg17: memref<1x32xf32, #tpu.memory_space<vmem>>, %arg18: memref<32x96xf32, #tpu.memory_space<vmem>>, %arg19: memref<1x96xf32, #tpu.memory_space<vmem>>, %arg20: memref<32x32xf32, #tpu.memory_space<vmem>>, %arg21: memref<1x32xf32, #tpu.memory_space<vmem>>, %arg22: memref<1x32xf32, #tpu.memory_space<vmem>>, %arg23: memref<1x32xf32, #tpu.memory_space<vmem>>, %arg24: memref<32x128xf32, #tpu.memory_space<vmem>>, %arg25: memref<1x128xf32, #tpu.memory_space<vmem>>, %arg26: memref<128x32xf32, #tpu.memory_space<vmem>>, %arg27: memref<1x32xf32, #tpu.memory_space<vmem>>, %arg28: memref<1x32xf32, #tpu.memory_space<vmem>>, %arg29: memref<1x32xf32, #tpu.memory_space<vmem>>, %arg30: memref<32x64xf32, #tpu.memory_space<vmem>>, %arg31: memref<1x64xf32, #tpu.memory_space<vmem>>, %arg32: memref<16x64xf32, #tpu.memory_space<vmem>>) attributes {dimension_semantics = [#tpu.dimension_semantics<arbitrary>], iteration_bounds = array<i64: 1>, scalar_prefetch = 0 : i64, scratch_operands = 0 : i64, tpu.core_type = #tpu.core_type<tc>, window_params = [{pipeline_mode = #tpu.pipeline_mode<synchronous>, transform_indices = @transform_0, window_bounds = array<i64: 16, 1>}, {pipeline_mode = #tpu.pipeline_mode<synchronous>, transform_indices = @transform_1, window_bounds = array<i64: 64, 32>}, {pipeline_mode = #tpu.pipeline_mode<synchronous>, transform_indices = @transform_2, window_bounds = array<i64: 8, 32>}, {pipeline_mode = #tpu.pipeline_mode<synchronous>, transform_indices = @transform_3, window_bounds = array<i64: 1, 32>}, {pipeline_mode = #tpu.pipeline_mode<synchronous>, transform_indices = @transform_4, window_bounds = array<i64: 1, 32>}, {pipeline_mode = #tpu.pipeline_mode<synchronous>, transform_indices = @transform_5, window_bounds = array<i64: 32, 96>}, {pipeline_mode = #tpu.pipeline_mode<synchronous>, transform_indices = @transform_6, window_bounds = array<i64: 1, 96>}, {pipeline_mode = #tpu.pipeline_mode<synchronous>, transform_indices = @transform_7, window_bounds = array<i64: 32, 32>}, {pipeline_mode = #tpu.pipeline_mode<synchronous>, transform_indices = @transform_8, window_bounds = array<i64: 1, 32>}, {pipeline_mode = #tpu.pipeline_mode<synchronous>, transform_indices = @transform_9, window_bounds = array<i64: 1, 32>}, {pipeline_mode = #tpu.pipeline_mode<synchronous>, transform_indices = @transform_10, window_bounds = array<i64: 1, 32>}, {pipeline_mode = #tpu.pipeline_mode<synchronous>, transform_indices = @transform_11, window_bounds = array<i64: 32, 128>}, {pipeline_mode = #tpu.pipeline_mode<synchronous>, transform_indices = @transform_12, window_bounds = array<i64: 1, 128>}, {pipeline_mode = #tpu.pipeline_mode<synchronous>, transform_indices = @transform_13, window_bounds = array<i64: 128, 32>}, {pipeline_mode = #tpu.pipeline_mode<synchronous>, transform_indices = @transform_14, window_bounds = array<i64: 1, 32>}, {pipeline_mode = #tpu.pipeline_mode<synchronous>, transform_indices = @transform_15, window_bounds = array<i64: 1, 32>}, {pipeline_mode = #tpu.pipeline_mode<synchronous>, transform_indices = @transform_16, window_bounds = array<i64: 1, 32>}, {pipeline_mode = #tpu.pipeline_mode<synchronous>, transform_indices = @transform_17, window_bounds = array<i64: 32, 96>}, {pipeline_mode = #tpu.pipeline_mode<synchronous>, transform_indices = @transform_18, window_bounds = array<i64: 1, 96>}, {pipeline_mode = #tpu.pipeline_mode<synchronous>, transform_indices = @transform_19, window_bounds = array<i64: 32, 32>}, {pipeline_mode = #tpu.pipeline_mode<synchronous>, transform_indices = @transform_20, window_bounds = array<i64: 1, 32>}, {pipeline_mode = #tpu.pipeline_mode<synchronous>, transform_indices = @transform_21, window_bounds = array<i64: 1, 32>}, {pipeline_mode = #tpu.pipeline_mode<synchronous>, transform_indices = @transform_22, window_bounds = array<i64: 1, 32>}, {pipeline_mode = #tpu.pipeline_mode<synchronous>, transform_indices = @transform_23, window_bounds = array<i64: 32, 128>}, {pipeline_mode = #tpu.pipeline_mode<synchronous>, transform_indices = @transform_24, window_bounds = array<i64: 1, 128>}, {pipeline_mode = #tpu.pipeline_mode<synchronous>, transform_indices = @transform_25, window_bounds = array<i64: 128, 32>}, {pipeline_mode = #tpu.pipeline_mode<synchronous>, transform_indices = @transform_26, window_bounds = array<i64: 1, 32>}, {pipeline_mode = #tpu.pipeline_mode<synchronous>, transform_indices = @transform_27, window_bounds = array<i64: 1, 32>}, {pipeline_mode = #tpu.pipeline_mode<synchronous>, transform_indices = @transform_28, window_bounds = array<i64: 1, 32>}, {pipeline_mode = #tpu.pipeline_mode<synchronous>, transform_indices = @transform_29, window_bounds = array<i64: 32, 64>}, {pipeline_mode = #tpu.pipeline_mode<synchronous>, transform_indices = @transform_30, window_bounds = array<i64: 1, 64>}, {pipeline_mode = #tpu.pipeline_mode<synchronous>, transform_indices = @transform_31, window_bounds = array<i64: 16, 64>}]} {
    %c0 = arith.constant 0 : index
    %c0_0 = arith.constant 0 : index
    %0 = vector.load %arg1[%c0, %c0_0] : memref<16x1xi32, #tpu.memory_space<vmem>>, vector<16x1xi32>
    %1 = tpu.iota {dimensions = array<i32: 1>} : vector<16x64xi32>
    %2 = vector.broadcast %0 : vector<16x1xi32> to vector<16x64xi32>
    %3 = arith.cmpi eq, %1, %2 : vector<16x64xi32>
    %4 = arith.extui %3 : vector<16x64xi1> to vector<16x64xi32>
    %5 = arith.sitofp %4 : vector<16x64xi32> to vector<16x64xf32>
    %c0_1 = arith.constant 0 : index
    %c0_2 = arith.constant 0 : index
    %6 = vector.load %arg2[%c0_1, %c0_2] : memref<64x32xf32, #tpu.memory_space<vmem>>, vector<64x32xf32>
    %cst = arith.constant dense<0.000000e+00> : vector<16x32xf32>
    %7 = tpu.matmul %5, %6, %cst {dimension_numbers = #tpu.dot_dimension_numbers<[1], [0], [0], [1], [0, 0, 1, 1], [], []>} : vector<16x64xf32>, vector<64x32xf32>, vector<16x32xf32> -> vector<16x32xf32>
    %8 = tpu.iota {dimensions = array<i32: 0>} : vector<16x8xi32>
    %9 = tpu.iota {dimensions = array<i32: 1>} : vector<16x8xi32>
    %cst_3 = arith.constant 0.000000e+00 : f32
    %10 = vector.broadcast %cst_3 : f32 to vector<16x8xf32>
    %c0_i32 = arith.constant 0 : i32
    %11 = vector.broadcast %c0_i32 : i32 to vector<16x8xi32>
    %12 = arith.cmpi sge, %8, %11 : vector<16x8xi32>
    %c8_i32 = arith.constant 8 : i32
    %13 = vector.broadcast %c8_i32 : i32 to vector<16x8xi32>
    %14 = arith.cmpi slt, %8, %13 : vector<16x8xi32>
    %15 = arith.andi %12, %14 : vector<16x8xi1>
    %c0_i32_4 = arith.constant 0 : i32
    %16 = vector.broadcast %c0_i32_4 : i32 to vector<16x8xi32>
    %17 = arith.subi %8, %16 : vector<16x8xi32>
    %18 = arith.cmpi eq, %9, %17 : vector<16x8xi32>
    %19 = arith.andi %15, %18 : vector<16x8xi1>
    %cst_5 = arith.constant 1.000000e+00 : f32
    %20 = vector.broadcast %cst_5 : f32 to vector<16x8xf32>
    %21 = arith.select %19, %20, %10 : vector<16x8xi1>, vector<16x8xf32>
    %c8_i32_6 = arith.constant 8 : i32
    %22 = vector.broadcast %c8_i32_6 : i32 to vector<16x8xi32>
    %23 = arith.cmpi sge, %8, %22 : vector<16x8xi32>
    %c16_i32 = arith.constant 16 : i32
    %24 = vector.broadcast %c16_i32 : i32 to vector<16x8xi32>
    %25 = arith.cmpi slt, %8, %24 : vector<16x8xi32>
    %26 = arith.andi %23, %25 : vector<16x8xi1>
    %c8_i32_7 = arith.constant 8 : i32
    %27 = vector.broadcast %c8_i32_7 : i32 to vector<16x8xi32>
    %28 = arith.subi %8, %27 : vector<16x8xi32>
    %29 = arith.cmpi eq, %9, %28 : vector<16x8xi32>
    %30 = arith.andi %26, %29 : vector<16x8xi1>
    %cst_8 = arith.constant 1.000000e+00 : f32
    %31 = vector.broadcast %cst_8 : f32 to vector<16x8xf32>
    %32 = arith.select %30, %31, %21 : vector<16x8xi1>, vector<16x8xf32>
    %c0_9 = arith.constant 0 : index
    %c0_10 = arith.constant 0 : index
    %33 = vector.load %arg3[%c0_9, %c0_10] : memref<8x32xf32, #tpu.memory_space<vmem>>, vector<8x32xf32>
    %cst_11 = arith.constant dense<0.000000e+00> : vector<16x32xf32>
    %34 = tpu.matmul %32, %33, %cst_11 {dimension_numbers = #tpu.dot_dimension_numbers<[1], [0], [0], [1], [0, 0, 1, 1], [], []>} : vector<16x8xf32>, vector<8x32xf32>, vector<16x32xf32> -> vector<16x32xf32>
    %35 = arith.addf %7, %34 : vector<16x32xf32>
    %36 = tpu.iota {dimensions = array<i32: 0>} : vector<16x16xi32>
    %37 = tpu.iota {dimensions = array<i32: 1>} : vector<16x16xi32>
    %false = arith.constant false
    %38 = vector.broadcast %false : i1 to vector<16x16xi1>
    %c0_i32_12 = arith.constant 0 : i32
    %39 = vector.broadcast %c0_i32_12 : i32 to vector<16x16xi32>
    %40 = arith.cmpi sge, %36, %39 : vector<16x16xi32>
    %c8_i32_13 = arith.constant 8 : i32
    %41 = vector.broadcast %c8_i32_13 : i32 to vector<16x16xi32>
    %42 = arith.cmpi slt, %36, %41 : vector<16x16xi32>
    %43 = arith.andi %40, %42 : vector<16x16xi1>
    %c0_i32_14 = arith.constant 0 : i32
    %44 = vector.broadcast %c0_i32_14 : i32 to vector<16x16xi32>
    %45 = arith.cmpi sge, %37, %44 : vector<16x16xi32>
    %c8_i32_15 = arith.constant 8 : i32
    %46 = vector.broadcast %c8_i32_15 : i32 to vector<16x16xi32>
    %47 = arith.cmpi slt, %37, %46 : vector<16x16xi32>
    %48 = arith.andi %45, %47 : vector<16x16xi1>
    %49 = arith.andi %43, %48 : vector<16x16xi1>
    %50 = arith.ori %38, %49 : vector<16x16xi1>
    %c8_i32_16 = arith.constant 8 : i32
    %51 = vector.broadcast %c8_i32_16 : i32 to vector<16x16xi32>
    %52 = arith.cmpi sge, %36, %51 : vector<16x16xi32>
    %c16_i32_17 = arith.constant 16 : i32
    %53 = vector.broadcast %c16_i32_17 : i32 to vector<16x16xi32>
    %54 = arith.cmpi slt, %36, %53 : vector<16x16xi32>
    %55 = arith.andi %52, %54 : vector<16x16xi1>
    %c8_i32_18 = arith.constant 8 : i32
    %56 = vector.broadcast %c8_i32_18 : i32 to vector<16x16xi32>
    %57 = arith.cmpi sge, %37, %56 : vector<16x16xi32>
    %c16_i32_19 = arith.constant 16 : i32
    %58 = vector.broadcast %c16_i32_19 : i32 to vector<16x16xi32>
    %59 = arith.cmpi slt, %37, %58 : vector<16x16xi32>
    %60 = arith.andi %57, %59 : vector<16x16xi1>
    %61 = arith.andi %55, %60 : vector<16x16xi1>
    %62 = arith.ori %50, %61 : vector<16x16xi1>
    %63 = arith.cmpi sle, %37, %36 : vector<16x16xi32>
    %64 = arith.andi %62, %63 : vector<16x16xi1>
    %c0_20 = arith.constant 0 : index
    %c0_21 = arith.constant 0 : index
    %65 = vector.load %arg4[%c0_20, %c0_21] : memref<1x32xf32, #tpu.memory_space<vmem>>, vector<1x32xf32>
    %c0_22 = arith.constant 0 : index
    %c0_23 = arith.constant 0 : index
    %66 = vector.load %arg5[%c0_22, %c0_23] : memref<1x32xf32, #tpu.memory_space<vmem>>, vector<1x32xf32>
    %cst_24 = arith.constant dense<0.000000e+00> : vector<16xf32>
    %67 = vector.multi_reduction <add>, %35, %cst_24 [1] : vector<16x32xf32> to vector<16xf32>
    %68 = vector.shape_cast %67 : vector<16xf32> to vector<16x1xf32>
    %cst_25 = arith.constant 3.200000e+01 : f32
    %69 = vector.broadcast %cst_25 : f32 to vector<16x1xf32>
    %70 = arith.divf %68, %69 : vector<16x1xf32>
    %71 = vector.broadcast %70 : vector<16x1xf32> to vector<16x32xf32>
    %72 = arith.subf %35, %71 : vector<16x32xf32>
    %73 = arith.mulf %72, %72 : vector<16x32xf32>
    %cst_26 = arith.constant dense<0.000000e+00> : vector<16xf32>
    %74 = vector.multi_reduction <add>, %73, %cst_26 [1] : vector<16x32xf32> to vector<16xf32>
    %75 = vector.shape_cast %74 : vector<16xf32> to vector<16x1xf32>
    %cst_27 = arith.constant 3.200000e+01 : f32
    %76 = vector.broadcast %cst_27 : f32 to vector<16x1xf32>
    %77 = arith.divf %75, %76 : vector<16x1xf32>
    %cst_28 = arith.constant 9.99999974E-6 : f32
    %78 = vector.broadcast %cst_28 : f32 to vector<16x1xf32>
    %79 = arith.addf %77, %78 : vector<16x1xf32>
    %80 = math.rsqrt %79 : vector<16x1xf32>
    %81 = vector.broadcast %80 : vector<16x1xf32> to vector<16x32xf32>
    %82 = arith.mulf %72, %81 : vector<16x32xf32>
    %83 = vector.broadcast %65 : vector<1x32xf32> to vector<16x32xf32>
    %84 = arith.mulf %82, %83 : vector<16x32xf32>
    %85 = vector.broadcast %66 : vector<1x32xf32> to vector<16x32xf32>
    %86 = arith.addf %84, %85 : vector<16x32xf32>
    %c0_29 = arith.constant 0 : index
    %c0_30 = arith.constant 0 : index
    %87 = vector.load %arg6[%c0_29, %c0_30] : memref<32x96xf32, #tpu.memory_space<vmem>>, vector<32x96xf32>
    %cst_31 = arith.constant dense<0.000000e+00> : vector<16x96xf32>
    %88 = tpu.matmul %86, %87, %cst_31 {dimension_numbers = #tpu.dot_dimension_numbers<[1], [0], [0], [1], [0, 0, 1, 1], [], []>} : vector<16x32xf32>, vector<32x96xf32>, vector<16x96xf32> -> vector<16x96xf32>
    %c0_32 = arith.constant 0 : index
    %c0_33 = arith.constant 0 : index
    %89 = vector.load %arg7[%c0_32, %c0_33] : memref<1x96xf32, #tpu.memory_space<vmem>>, vector<1x96xf32>
    %90 = vector.broadcast %89 : vector<1x96xf32> to vector<16x96xf32>
    %91 = arith.addf %88, %90 : vector<16x96xf32>
    %c0_34 = arith.constant 0 : index
    %c0_35 = arith.constant 0 : index
    %92 = vector.load %arg8[%c0_34, %c0_35] : memref<32x32xf32, #tpu.memory_space<vmem>>, vector<32x32xf32>
    %93 = vector.extract_strided_slice %91 {offsets = [0, 0], sizes = [16, 8], strides = [1, 1]} : vector<16x96xf32> to vector<16x8xf32>
    %94 = vector.extract_strided_slice %91 {offsets = [0, 32], sizes = [16, 8], strides = [1, 1]} : vector<16x96xf32> to vector<16x8xf32>
    %95 = vector.extract_strided_slice %91 {offsets = [0, 64], sizes = [16, 8], strides = [1, 1]} : vector<16x96xf32> to vector<16x8xf32>
    %cst_36 = arith.constant dense<0.000000e+00> : vector<16x16xf32>
    %96 = tpu.matmul %93, %94, %cst_36 {dimension_numbers = #tpu.dot_dimension_numbers<[1], [1], [0], [0], [0, 0, 1, 0], [], []>} : vector<16x8xf32>, vector<16x8xf32>, vector<16x16xf32> -> vector<16x16xf32>
    %cst_37 = arith.constant 0.353553385 : f32
    %97 = vector.broadcast %cst_37 : f32 to vector<16x16xf32>
    %98 = arith.mulf %96, %97 : vector<16x16xf32>
    %cst_38 = arith.constant -1.000000e+30 : f32
    %99 = vector.broadcast %cst_38 : f32 to vector<16x16xf32>
    %100 = arith.select %64, %98, %99 : vector<16x16xi1>, vector<16x16xf32>
    %cst_39 = arith.constant dense<0xFF800000> : vector<16xf32>
    %101 = vector.multi_reduction <maximumf>, %100, %cst_39 [1] : vector<16x16xf32> to vector<16xf32>
    %102 = vector.shape_cast %101 : vector<16xf32> to vector<16x1xf32>
    %103 = vector.broadcast %102 : vector<16x1xf32> to vector<16x16xf32>
    %104 = arith.subf %100, %103 : vector<16x16xf32>
    %105 = math.exp %104 : vector<16x16xf32>
    %cst_40 = arith.constant dense<0.000000e+00> : vector<16xf32>
    %106 = vector.multi_reduction <add>, %105, %cst_40 [1] : vector<16x16xf32> to vector<16xf32>
    %107 = vector.shape_cast %106 : vector<16xf32> to vector<16x1xf32>
    %108 = tpu.reciprocal %107 {approx = true} : vector<16x1xf32> -> vector<16x1xf32>
    %109 = vector.broadcast %108 : vector<16x1xf32> to vector<16x16xf32>
    %110 = arith.mulf %105, %109 : vector<16x16xf32>
    %cst_41 = arith.constant dense<0.000000e+00> : vector<16x8xf32>
    %111 = tpu.matmul %110, %95, %cst_41 {dimension_numbers = #tpu.dot_dimension_numbers<[1], [0], [0], [1], [0, 0, 1, 1], [], []>} : vector<16x16xf32>, vector<16x8xf32>, vector<16x8xf32> -> vector<16x8xf32>
    %112 = vector.extract_strided_slice %92 {offsets = [0, 0], sizes = [8, 32], strides = [1, 1]} : vector<32x32xf32> to vector<8x32xf32>
    %cst_42 = arith.constant dense<0.000000e+00> : vector<16x32xf32>
    %113 = tpu.matmul %111, %112, %cst_42 {dimension_numbers = #tpu.dot_dimension_numbers<[1], [0], [0], [1], [0, 0, 1, 1], [], []>} : vector<16x8xf32>, vector<8x32xf32>, vector<16x32xf32> -> vector<16x32xf32>
    %114 = vector.extract_strided_slice %91 {offsets = [0, 8], sizes = [16, 8], strides = [1, 1]} : vector<16x96xf32> to vector<16x8xf32>
    %115 = vector.extract_strided_slice %91 {offsets = [0, 40], sizes = [16, 8], strides = [1, 1]} : vector<16x96xf32> to vector<16x8xf32>
    %116 = vector.extract_strided_slice %91 {offsets = [0, 72], sizes = [16, 8], strides = [1, 1]} : vector<16x96xf32> to vector<16x8xf32>
    %cst_43 = arith.constant dense<0.000000e+00> : vector<16x16xf32>
    %117 = tpu.matmul %114, %115, %cst_43 {dimension_numbers = #tpu.dot_dimension_numbers<[1], [1], [0], [0], [0, 0, 1, 0], [], []>} : vector<16x8xf32>, vector<16x8xf32>, vector<16x16xf32> -> vector<16x16xf32>
    %cst_44 = arith.constant 0.353553385 : f32
    %118 = vector.broadcast %cst_44 : f32 to vector<16x16xf32>
    %119 = arith.mulf %117, %118 : vector<16x16xf32>
    %cst_45 = arith.constant -1.000000e+30 : f32
    %120 = vector.broadcast %cst_45 : f32 to vector<16x16xf32>
    %121 = arith.select %64, %119, %120 : vector<16x16xi1>, vector<16x16xf32>
    %cst_46 = arith.constant dense<0xFF800000> : vector<16xf32>
    %122 = vector.multi_reduction <maximumf>, %121, %cst_46 [1] : vector<16x16xf32> to vector<16xf32>
    %123 = vector.shape_cast %122 : vector<16xf32> to vector<16x1xf32>
    %124 = vector.broadcast %123 : vector<16x1xf32> to vector<16x16xf32>
    %125 = arith.subf %121, %124 : vector<16x16xf32>
    %126 = math.exp %125 : vector<16x16xf32>
    %cst_47 = arith.constant dense<0.000000e+00> : vector<16xf32>
    %127 = vector.multi_reduction <add>, %126, %cst_47 [1] : vector<16x16xf32> to vector<16xf32>
    %128 = vector.shape_cast %127 : vector<16xf32> to vector<16x1xf32>
    %129 = tpu.reciprocal %128 {approx = true} : vector<16x1xf32> -> vector<16x1xf32>
    %130 = vector.broadcast %129 : vector<16x1xf32> to vector<16x16xf32>
    %131 = arith.mulf %126, %130 : vector<16x16xf32>
    %cst_48 = arith.constant dense<0.000000e+00> : vector<16x8xf32>
    %132 = tpu.matmul %131, %116, %cst_48 {dimension_numbers = #tpu.dot_dimension_numbers<[1], [0], [0], [1], [0, 0, 1, 1], [], []>} : vector<16x16xf32>, vector<16x8xf32>, vector<16x8xf32> -> vector<16x8xf32>
    %133 = vector.extract_strided_slice %92 {offsets = [8, 0], sizes = [8, 32], strides = [1, 1]} : vector<32x32xf32> to vector<8x32xf32>
    %cst_49 = arith.constant dense<0.000000e+00> : vector<16x32xf32>
    %134 = tpu.matmul %132, %133, %cst_49 {dimension_numbers = #tpu.dot_dimension_numbers<[1], [0], [0], [1], [0, 0, 1, 1], [], []>} : vector<16x8xf32>, vector<8x32xf32>, vector<16x32xf32> -> vector<16x32xf32>
    %135 = arith.addf %113, %134 : vector<16x32xf32>
    %136 = vector.extract_strided_slice %91 {offsets = [0, 16], sizes = [16, 8], strides = [1, 1]} : vector<16x96xf32> to vector<16x8xf32>
    %137 = vector.extract_strided_slice %91 {offsets = [0, 48], sizes = [16, 8], strides = [1, 1]} : vector<16x96xf32> to vector<16x8xf32>
    %138 = vector.extract_strided_slice %91 {offsets = [0, 80], sizes = [16, 8], strides = [1, 1]} : vector<16x96xf32> to vector<16x8xf32>
    %cst_50 = arith.constant dense<0.000000e+00> : vector<16x16xf32>
    %139 = tpu.matmul %136, %137, %cst_50 {dimension_numbers = #tpu.dot_dimension_numbers<[1], [1], [0], [0], [0, 0, 1, 0], [], []>} : vector<16x8xf32>, vector<16x8xf32>, vector<16x16xf32> -> vector<16x16xf32>
    %cst_51 = arith.constant 0.353553385 : f32
    %140 = vector.broadcast %cst_51 : f32 to vector<16x16xf32>
    %141 = arith.mulf %139, %140 : vector<16x16xf32>
    %cst_52 = arith.constant -1.000000e+30 : f32
    %142 = vector.broadcast %cst_52 : f32 to vector<16x16xf32>
    %143 = arith.select %64, %141, %142 : vector<16x16xi1>, vector<16x16xf32>
    %cst_53 = arith.constant dense<0xFF800000> : vector<16xf32>
    %144 = vector.multi_reduction <maximumf>, %143, %cst_53 [1] : vector<16x16xf32> to vector<16xf32>
    %145 = vector.shape_cast %144 : vector<16xf32> to vector<16x1xf32>
    %146 = vector.broadcast %145 : vector<16x1xf32> to vector<16x16xf32>
    %147 = arith.subf %143, %146 : vector<16x16xf32>
    %148 = math.exp %147 : vector<16x16xf32>
    %cst_54 = arith.constant dense<0.000000e+00> : vector<16xf32>
    %149 = vector.multi_reduction <add>, %148, %cst_54 [1] : vector<16x16xf32> to vector<16xf32>
    %150 = vector.shape_cast %149 : vector<16xf32> to vector<16x1xf32>
    %151 = tpu.reciprocal %150 {approx = true} : vector<16x1xf32> -> vector<16x1xf32>
    %152 = vector.broadcast %151 : vector<16x1xf32> to vector<16x16xf32>
    %153 = arith.mulf %148, %152 : vector<16x16xf32>
    %cst_55 = arith.constant dense<0.000000e+00> : vector<16x8xf32>
    %154 = tpu.matmul %153, %138, %cst_55 {dimension_numbers = #tpu.dot_dimension_numbers<[1], [0], [0], [1], [0, 0, 1, 1], [], []>} : vector<16x16xf32>, vector<16x8xf32>, vector<16x8xf32> -> vector<16x8xf32>
    %155 = vector.extract_strided_slice %92 {offsets = [16, 0], sizes = [8, 32], strides = [1, 1]} : vector<32x32xf32> to vector<8x32xf32>
    %cst_56 = arith.constant dense<0.000000e+00> : vector<16x32xf32>
    %156 = tpu.matmul %154, %155, %cst_56 {dimension_numbers = #tpu.dot_dimension_numbers<[1], [0], [0], [1], [0, 0, 1, 1], [], []>} : vector<16x8xf32>, vector<8x32xf32>, vector<16x32xf32> -> vector<16x32xf32>
    %157 = arith.addf %135, %156 : vector<16x32xf32>
    %158 = vector.extract_strided_slice %91 {offsets = [0, 24], sizes = [16, 8], strides = [1, 1]} : vector<16x96xf32> to vector<16x8xf32>
    %159 = vector.extract_strided_slice %91 {offsets = [0, 56], sizes = [16, 8], strides = [1, 1]} : vector<16x96xf32> to vector<16x8xf32>
    %160 = vector.extract_strided_slice %91 {offsets = [0, 88], sizes = [16, 8], strides = [1, 1]} : vector<16x96xf32> to vector<16x8xf32>
    %cst_57 = arith.constant dense<0.000000e+00> : vector<16x16xf32>
    %161 = tpu.matmul %158, %159, %cst_57 {dimension_numbers = #tpu.dot_dimension_numbers<[1], [1], [0], [0], [0, 0, 1, 0], [], []>} : vector<16x8xf32>, vector<16x8xf32>, vector<16x16xf32> -> vector<16x16xf32>
    %cst_58 = arith.constant 0.353553385 : f32
    %162 = vector.broadcast %cst_58 : f32 to vector<16x16xf32>
    %163 = arith.mulf %161, %162 : vector<16x16xf32>
    %cst_59 = arith.constant -1.000000e+30 : f32
    %164 = vector.broadcast %cst_59 : f32 to vector<16x16xf32>
    %165 = arith.select %64, %163, %164 : vector<16x16xi1>, vector<16x16xf32>
    %cst_60 = arith.constant dense<0xFF800000> : vector<16xf32>
    %166 = vector.multi_reduction <maximumf>, %165, %cst_60 [1] : vector<16x16xf32> to vector<16xf32>
    %167 = vector.shape_cast %166 : vector<16xf32> to vector<16x1xf32>
    %168 = vector.broadcast %167 : vector<16x1xf32> to vector<16x16xf32>
    %169 = arith.subf %165, %168 : vector<16x16xf32>
    %170 = math.exp %169 : vector<16x16xf32>
    %cst_61 = arith.constant dense<0.000000e+00> : vector<16xf32>
    %171 = vector.multi_reduction <add>, %170, %cst_61 [1] : vector<16x16xf32> to vector<16xf32>
    %172 = vector.shape_cast %171 : vector<16xf32> to vector<16x1xf32>
    %173 = tpu.reciprocal %172 {approx = true} : vector<16x1xf32> -> vector<16x1xf32>
    %174 = vector.broadcast %173 : vector<16x1xf32> to vector<16x16xf32>
    %175 = arith.mulf %170, %174 : vector<16x16xf32>
    %cst_62 = arith.constant dense<0.000000e+00> : vector<16x8xf32>
    %176 = tpu.matmul %175, %160, %cst_62 {dimension_numbers = #tpu.dot_dimension_numbers<[1], [0], [0], [1], [0, 0, 1, 1], [], []>} : vector<16x16xf32>, vector<16x8xf32>, vector<16x8xf32> -> vector<16x8xf32>
    %177 = vector.extract_strided_slice %92 {offsets = [24, 0], sizes = [8, 32], strides = [1, 1]} : vector<32x32xf32> to vector<8x32xf32>
    %cst_63 = arith.constant dense<0.000000e+00> : vector<16x32xf32>
    %178 = tpu.matmul %176, %177, %cst_63 {dimension_numbers = #tpu.dot_dimension_numbers<[1], [0], [0], [1], [0, 0, 1, 1], [], []>} : vector<16x8xf32>, vector<8x32xf32>, vector<16x32xf32> -> vector<16x32xf32>
    %179 = arith.addf %157, %178 : vector<16x32xf32>
    %180 = arith.addf %35, %179 : vector<16x32xf32>
    %c0_64 = arith.constant 0 : index
    %c0_65 = arith.constant 0 : index
    %181 = vector.load %arg9[%c0_64, %c0_65] : memref<1x32xf32, #tpu.memory_space<vmem>>, vector<1x32xf32>
    %182 = vector.broadcast %181 : vector<1x32xf32> to vector<16x32xf32>
    %183 = arith.addf %180, %182 : vector<16x32xf32>
    %c0_66 = arith.constant 0 : index
    %c0_67 = arith.constant 0 : index
    %184 = vector.load %arg10[%c0_66, %c0_67] : memref<1x32xf32, #tpu.memory_space<vmem>>, vector<1x32xf32>
    %c0_68 = arith.constant 0 : index
    %c0_69 = arith.constant 0 : index
    %185 = vector.load %arg11[%c0_68, %c0_69] : memref<1x32xf32, #tpu.memory_space<vmem>>, vector<1x32xf32>
    %cst_70 = arith.constant dense<0.000000e+00> : vector<16xf32>
    %186 = vector.multi_reduction <add>, %183, %cst_70 [1] : vector<16x32xf32> to vector<16xf32>
    %187 = vector.shape_cast %186 : vector<16xf32> to vector<16x1xf32>
    %cst_71 = arith.constant 3.200000e+01 : f32
    %188 = vector.broadcast %cst_71 : f32 to vector<16x1xf32>
    %189 = arith.divf %187, %188 : vector<16x1xf32>
    %190 = vector.broadcast %189 : vector<16x1xf32> to vector<16x32xf32>
    %191 = arith.subf %183, %190 : vector<16x32xf32>
    %192 = arith.mulf %191, %191 : vector<16x32xf32>
    %cst_72 = arith.constant dense<0.000000e+00> : vector<16xf32>
    %193 = vector.multi_reduction <add>, %192, %cst_72 [1] : vector<16x32xf32> to vector<16xf32>
    %194 = vector.shape_cast %193 : vector<16xf32> to vector<16x1xf32>
    %cst_73 = arith.constant 3.200000e+01 : f32
    %195 = vector.broadcast %cst_73 : f32 to vector<16x1xf32>
    %196 = arith.divf %194, %195 : vector<16x1xf32>
    %cst_74 = arith.constant 9.99999974E-6 : f32
    %197 = vector.broadcast %cst_74 : f32 to vector<16x1xf32>
    %198 = arith.addf %196, %197 : vector<16x1xf32>
    %199 = math.rsqrt %198 : vector<16x1xf32>
    %200 = vector.broadcast %199 : vector<16x1xf32> to vector<16x32xf32>
    %201 = arith.mulf %191, %200 : vector<16x32xf32>
    %202 = vector.broadcast %184 : vector<1x32xf32> to vector<16x32xf32>
    %203 = arith.mulf %201, %202 : vector<16x32xf32>
    %204 = vector.broadcast %185 : vector<1x32xf32> to vector<16x32xf32>
    %205 = arith.addf %203, %204 : vector<16x32xf32>
    %c0_75 = arith.constant 0 : index
    %c0_76 = arith.constant 0 : index
    %206 = vector.load %arg12[%c0_75, %c0_76] : memref<32x128xf32, #tpu.memory_space<vmem>>, vector<32x128xf32>
    %cst_77 = arith.constant dense<0.000000e+00> : vector<16x128xf32>
    %207 = tpu.matmul %205, %206, %cst_77 {dimension_numbers = #tpu.dot_dimension_numbers<[1], [0], [0], [1], [0, 0, 1, 1], [], []>} : vector<16x32xf32>, vector<32x128xf32>, vector<16x128xf32> -> vector<16x128xf32>
    %c0_78 = arith.constant 0 : index
    %c0_79 = arith.constant 0 : index
    %208 = vector.load %arg13[%c0_78, %c0_79] : memref<1x128xf32, #tpu.memory_space<vmem>>, vector<1x128xf32>
    %209 = vector.broadcast %208 : vector<1x128xf32> to vector<16x128xf32>
    %210 = arith.addf %207, %209 : vector<16x128xf32>
    %cst_80 = arith.constant 5.000000e-01 : f32
    %211 = vector.broadcast %cst_80 : f32 to vector<16x128xf32>
    %212 = arith.mulf %211, %210 : vector<16x128xf32>
    %cst_81 = arith.constant 0.707106769 : f32
    %213 = vector.broadcast %cst_81 : f32 to vector<16x128xf32>
    %214 = arith.mulf %210, %213 : vector<16x128xf32>
    %215 = math.erf %214 : vector<16x128xf32>
    %cst_82 = arith.constant 1.000000e+00 : f32
    %216 = vector.broadcast %cst_82 : f32 to vector<16x128xf32>
    %217 = arith.addf %216, %215 : vector<16x128xf32>
    %218 = arith.mulf %212, %217 : vector<16x128xf32>
    %c0_83 = arith.constant 0 : index
    %c0_84 = arith.constant 0 : index
    %219 = vector.load %arg14[%c0_83, %c0_84] : memref<128x32xf32, #tpu.memory_space<vmem>>, vector<128x32xf32>
    %cst_85 = arith.constant dense<0.000000e+00> : vector<16x32xf32>
    %220 = tpu.matmul %218, %219, %cst_85 {dimension_numbers = #tpu.dot_dimension_numbers<[1], [0], [0], [1], [0, 0, 1, 1], [], []>} : vector<16x128xf32>, vector<128x32xf32>, vector<16x32xf32> -> vector<16x32xf32>
    %221 = arith.addf %183, %220 : vector<16x32xf32>
    %c0_86 = arith.constant 0 : index
    %c0_87 = arith.constant 0 : index
    %222 = vector.load %arg15[%c0_86, %c0_87] : memref<1x32xf32, #tpu.memory_space<vmem>>, vector<1x32xf32>
    %223 = vector.broadcast %222 : vector<1x32xf32> to vector<16x32xf32>
    %224 = arith.addf %221, %223 : vector<16x32xf32>
    %c0_88 = arith.constant 0 : index
    %c0_89 = arith.constant 0 : index
    %225 = vector.load %arg16[%c0_88, %c0_89] : memref<1x32xf32, #tpu.memory_space<vmem>>, vector<1x32xf32>
    %c0_90 = arith.constant 0 : index
    %c0_91 = arith.constant 0 : index
    %226 = vector.load %arg17[%c0_90, %c0_91] : memref<1x32xf32, #tpu.memory_space<vmem>>, vector<1x32xf32>
    %cst_92 = arith.constant dense<0.000000e+00> : vector<16xf32>
    %227 = vector.multi_reduction <add>, %224, %cst_92 [1] : vector<16x32xf32> to vector<16xf32>
    %228 = vector.shape_cast %227 : vector<16xf32> to vector<16x1xf32>
    %cst_93 = arith.constant 3.200000e+01 : f32
    %229 = vector.broadcast %cst_93 : f32 to vector<16x1xf32>
    %230 = arith.divf %228, %229 : vector<16x1xf32>
    %231 = vector.broadcast %230 : vector<16x1xf32> to vector<16x32xf32>
    %232 = arith.subf %224, %231 : vector<16x32xf32>
    %233 = arith.mulf %232, %232 : vector<16x32xf32>
    %cst_94 = arith.constant dense<0.000000e+00> : vector<16xf32>
    %234 = vector.multi_reduction <add>, %233, %cst_94 [1] : vector<16x32xf32> to vector<16xf32>
    %235 = vector.shape_cast %234 : vector<16xf32> to vector<16x1xf32>
    %cst_95 = arith.constant 3.200000e+01 : f32
    %236 = vector.broadcast %cst_95 : f32 to vector<16x1xf32>
    %237 = arith.divf %235, %236 : vector<16x1xf32>
    %cst_96 = arith.constant 9.99999974E-6 : f32
    %238 = vector.broadcast %cst_96 : f32 to vector<16x1xf32>
    %239 = arith.addf %237, %238 : vector<16x1xf32>
    %240 = math.rsqrt %239 : vector<16x1xf32>
    %241 = vector.broadcast %240 : vector<16x1xf32> to vector<16x32xf32>
    %242 = arith.mulf %232, %241 : vector<16x32xf32>
    %243 = vector.broadcast %225 : vector<1x32xf32> to vector<16x32xf32>
    %244 = arith.mulf %242, %243 : vector<16x32xf32>
    %245 = vector.broadcast %226 : vector<1x32xf32> to vector<16x32xf32>
    %246 = arith.addf %244, %245 : vector<16x32xf32>
    %c0_97 = arith.constant 0 : index
    %c0_98 = arith.constant 0 : index
    %247 = vector.load %arg18[%c0_97, %c0_98] : memref<32x96xf32, #tpu.memory_space<vmem>>, vector<32x96xf32>
    %cst_99 = arith.constant dense<0.000000e+00> : vector<16x96xf32>
    %248 = tpu.matmul %246, %247, %cst_99 {dimension_numbers = #tpu.dot_dimension_numbers<[1], [0], [0], [1], [0, 0, 1, 1], [], []>} : vector<16x32xf32>, vector<32x96xf32>, vector<16x96xf32> -> vector<16x96xf32>
    %c0_100 = arith.constant 0 : index
    %c0_101 = arith.constant 0 : index
    %249 = vector.load %arg19[%c0_100, %c0_101] : memref<1x96xf32, #tpu.memory_space<vmem>>, vector<1x96xf32>
    %250 = vector.broadcast %249 : vector<1x96xf32> to vector<16x96xf32>
    %251 = arith.addf %248, %250 : vector<16x96xf32>
    %c0_102 = arith.constant 0 : index
    %c0_103 = arith.constant 0 : index
    %252 = vector.load %arg20[%c0_102, %c0_103] : memref<32x32xf32, #tpu.memory_space<vmem>>, vector<32x32xf32>
    %253 = vector.extract_strided_slice %251 {offsets = [0, 0], sizes = [16, 8], strides = [1, 1]} : vector<16x96xf32> to vector<16x8xf32>
    %254 = vector.extract_strided_slice %251 {offsets = [0, 32], sizes = [16, 8], strides = [1, 1]} : vector<16x96xf32> to vector<16x8xf32>
    %255 = vector.extract_strided_slice %251 {offsets = [0, 64], sizes = [16, 8], strides = [1, 1]} : vector<16x96xf32> to vector<16x8xf32>
    %cst_104 = arith.constant dense<0.000000e+00> : vector<16x16xf32>
    %256 = tpu.matmul %253, %254, %cst_104 {dimension_numbers = #tpu.dot_dimension_numbers<[1], [1], [0], [0], [0, 0, 1, 0], [], []>} : vector<16x8xf32>, vector<16x8xf32>, vector<16x16xf32> -> vector<16x16xf32>
    %cst_105 = arith.constant 0.353553385 : f32
    %257 = vector.broadcast %cst_105 : f32 to vector<16x16xf32>
    %258 = arith.mulf %256, %257 : vector<16x16xf32>
    %cst_106 = arith.constant -1.000000e+30 : f32
    %259 = vector.broadcast %cst_106 : f32 to vector<16x16xf32>
    %260 = arith.select %64, %258, %259 : vector<16x16xi1>, vector<16x16xf32>
    %cst_107 = arith.constant dense<0xFF800000> : vector<16xf32>
    %261 = vector.multi_reduction <maximumf>, %260, %cst_107 [1] : vector<16x16xf32> to vector<16xf32>
    %262 = vector.shape_cast %261 : vector<16xf32> to vector<16x1xf32>
    %263 = vector.broadcast %262 : vector<16x1xf32> to vector<16x16xf32>
    %264 = arith.subf %260, %263 : vector<16x16xf32>
    %265 = math.exp %264 : vector<16x16xf32>
    %cst_108 = arith.constant dense<0.000000e+00> : vector<16xf32>
    %266 = vector.multi_reduction <add>, %265, %cst_108 [1] : vector<16x16xf32> to vector<16xf32>
    %267 = vector.shape_cast %266 : vector<16xf32> to vector<16x1xf32>
    %268 = tpu.reciprocal %267 {approx = true} : vector<16x1xf32> -> vector<16x1xf32>
    %269 = vector.broadcast %268 : vector<16x1xf32> to vector<16x16xf32>
    %270 = arith.mulf %265, %269 : vector<16x16xf32>
    %cst_109 = arith.constant dense<0.000000e+00> : vector<16x8xf32>
    %271 = tpu.matmul %270, %255, %cst_109 {dimension_numbers = #tpu.dot_dimension_numbers<[1], [0], [0], [1], [0, 0, 1, 1], [], []>} : vector<16x16xf32>, vector<16x8xf32>, vector<16x8xf32> -> vector<16x8xf32>
    %272 = vector.extract_strided_slice %252 {offsets = [0, 0], sizes = [8, 32], strides = [1, 1]} : vector<32x32xf32> to vector<8x32xf32>
    %cst_110 = arith.constant dense<0.000000e+00> : vector<16x32xf32>
    %273 = tpu.matmul %271, %272, %cst_110 {dimension_numbers = #tpu.dot_dimension_numbers<[1], [0], [0], [1], [0, 0, 1, 1], [], []>} : vector<16x8xf32>, vector<8x32xf32>, vector<16x32xf32> -> vector<16x32xf32>
    %274 = vector.extract_strided_slice %251 {offsets = [0, 8], sizes = [16, 8], strides = [1, 1]} : vector<16x96xf32> to vector<16x8xf32>
    %275 = vector.extract_strided_slice %251 {offsets = [0, 40], sizes = [16, 8], strides = [1, 1]} : vector<16x96xf32> to vector<16x8xf32>
    %276 = vector.extract_strided_slice %251 {offsets = [0, 72], sizes = [16, 8], strides = [1, 1]} : vector<16x96xf32> to vector<16x8xf32>
    %cst_111 = arith.constant dense<0.000000e+00> : vector<16x16xf32>
    %277 = tpu.matmul %274, %275, %cst_111 {dimension_numbers = #tpu.dot_dimension_numbers<[1], [1], [0], [0], [0, 0, 1, 0], [], []>} : vector<16x8xf32>, vector<16x8xf32>, vector<16x16xf32> -> vector<16x16xf32>
    %cst_112 = arith.constant 0.353553385 : f32
    %278 = vector.broadcast %cst_112 : f32 to vector<16x16xf32>
    %279 = arith.mulf %277, %278 : vector<16x16xf32>
    %cst_113 = arith.constant -1.000000e+30 : f32
    %280 = vector.broadcast %cst_113 : f32 to vector<16x16xf32>
    %281 = arith.select %64, %279, %280 : vector<16x16xi1>, vector<16x16xf32>
    %cst_114 = arith.constant dense<0xFF800000> : vector<16xf32>
    %282 = vector.multi_reduction <maximumf>, %281, %cst_114 [1] : vector<16x16xf32> to vector<16xf32>
    %283 = vector.shape_cast %282 : vector<16xf32> to vector<16x1xf32>
    %284 = vector.broadcast %283 : vector<16x1xf32> to vector<16x16xf32>
    %285 = arith.subf %281, %284 : vector<16x16xf32>
    %286 = math.exp %285 : vector<16x16xf32>
    %cst_115 = arith.constant dense<0.000000e+00> : vector<16xf32>
    %287 = vector.multi_reduction <add>, %286, %cst_115 [1] : vector<16x16xf32> to vector<16xf32>
    %288 = vector.shape_cast %287 : vector<16xf32> to vector<16x1xf32>
    %289 = tpu.reciprocal %288 {approx = true} : vector<16x1xf32> -> vector<16x1xf32>
    %290 = vector.broadcast %289 : vector<16x1xf32> to vector<16x16xf32>
    %291 = arith.mulf %286, %290 : vector<16x16xf32>
    %cst_116 = arith.constant dense<0.000000e+00> : vector<16x8xf32>
    %292 = tpu.matmul %291, %276, %cst_116 {dimension_numbers = #tpu.dot_dimension_numbers<[1], [0], [0], [1], [0, 0, 1, 1], [], []>} : vector<16x16xf32>, vector<16x8xf32>, vector<16x8xf32> -> vector<16x8xf32>
    %293 = vector.extract_strided_slice %252 {offsets = [8, 0], sizes = [8, 32], strides = [1, 1]} : vector<32x32xf32> to vector<8x32xf32>
    %cst_117 = arith.constant dense<0.000000e+00> : vector<16x32xf32>
    %294 = tpu.matmul %292, %293, %cst_117 {dimension_numbers = #tpu.dot_dimension_numbers<[1], [0], [0], [1], [0, 0, 1, 1], [], []>} : vector<16x8xf32>, vector<8x32xf32>, vector<16x32xf32> -> vector<16x32xf32>
    %295 = arith.addf %273, %294 : vector<16x32xf32>
    %296 = vector.extract_strided_slice %251 {offsets = [0, 16], sizes = [16, 8], strides = [1, 1]} : vector<16x96xf32> to vector<16x8xf32>
    %297 = vector.extract_strided_slice %251 {offsets = [0, 48], sizes = [16, 8], strides = [1, 1]} : vector<16x96xf32> to vector<16x8xf32>
    %298 = vector.extract_strided_slice %251 {offsets = [0, 80], sizes = [16, 8], strides = [1, 1]} : vector<16x96xf32> to vector<16x8xf32>
    %cst_118 = arith.constant dense<0.000000e+00> : vector<16x16xf32>
    %299 = tpu.matmul %296, %297, %cst_118 {dimension_numbers = #tpu.dot_dimension_numbers<[1], [1], [0], [0], [0, 0, 1, 0], [], []>} : vector<16x8xf32>, vector<16x8xf32>, vector<16x16xf32> -> vector<16x16xf32>
    %cst_119 = arith.constant 0.353553385 : f32
    %300 = vector.broadcast %cst_119 : f32 to vector<16x16xf32>
    %301 = arith.mulf %299, %300 : vector<16x16xf32>
    %cst_120 = arith.constant -1.000000e+30 : f32
    %302 = vector.broadcast %cst_120 : f32 to vector<16x16xf32>
    %303 = arith.select %64, %301, %302 : vector<16x16xi1>, vector<16x16xf32>
    %cst_121 = arith.constant dense<0xFF800000> : vector<16xf32>
    %304 = vector.multi_reduction <maximumf>, %303, %cst_121 [1] : vector<16x16xf32> to vector<16xf32>
    %305 = vector.shape_cast %304 : vector<16xf32> to vector<16x1xf32>
    %306 = vector.broadcast %305 : vector<16x1xf32> to vector<16x16xf32>
    %307 = arith.subf %303, %306 : vector<16x16xf32>
    %308 = math.exp %307 : vector<16x16xf32>
    %cst_122 = arith.constant dense<0.000000e+00> : vector<16xf32>
    %309 = vector.multi_reduction <add>, %308, %cst_122 [1] : vector<16x16xf32> to vector<16xf32>
    %310 = vector.shape_cast %309 : vector<16xf32> to vector<16x1xf32>
    %311 = tpu.reciprocal %310 {approx = true} : vector<16x1xf32> -> vector<16x1xf32>
    %312 = vector.broadcast %311 : vector<16x1xf32> to vector<16x16xf32>
    %313 = arith.mulf %308, %312 : vector<16x16xf32>
    %cst_123 = arith.constant dense<0.000000e+00> : vector<16x8xf32>
    %314 = tpu.matmul %313, %298, %cst_123 {dimension_numbers = #tpu.dot_dimension_numbers<[1], [0], [0], [1], [0, 0, 1, 1], [], []>} : vector<16x16xf32>, vector<16x8xf32>, vector<16x8xf32> -> vector<16x8xf32>
    %315 = vector.extract_strided_slice %252 {offsets = [16, 0], sizes = [8, 32], strides = [1, 1]} : vector<32x32xf32> to vector<8x32xf32>
    %cst_124 = arith.constant dense<0.000000e+00> : vector<16x32xf32>
    %316 = tpu.matmul %314, %315, %cst_124 {dimension_numbers = #tpu.dot_dimension_numbers<[1], [0], [0], [1], [0, 0, 1, 1], [], []>} : vector<16x8xf32>, vector<8x32xf32>, vector<16x32xf32> -> vector<16x32xf32>
    %317 = arith.addf %295, %316 : vector<16x32xf32>
    %318 = vector.extract_strided_slice %251 {offsets = [0, 24], sizes = [16, 8], strides = [1, 1]} : vector<16x96xf32> to vector<16x8xf32>
    %319 = vector.extract_strided_slice %251 {offsets = [0, 56], sizes = [16, 8], strides = [1, 1]} : vector<16x96xf32> to vector<16x8xf32>
    %320 = vector.extract_strided_slice %251 {offsets = [0, 88], sizes = [16, 8], strides = [1, 1]} : vector<16x96xf32> to vector<16x8xf32>
    %cst_125 = arith.constant dense<0.000000e+00> : vector<16x16xf32>
    %321 = tpu.matmul %318, %319, %cst_125 {dimension_numbers = #tpu.dot_dimension_numbers<[1], [1], [0], [0], [0, 0, 1, 0], [], []>} : vector<16x8xf32>, vector<16x8xf32>, vector<16x16xf32> -> vector<16x16xf32>
    %cst_126 = arith.constant 0.353553385 : f32
    %322 = vector.broadcast %cst_126 : f32 to vector<16x16xf32>
    %323 = arith.mulf %321, %322 : vector<16x16xf32>
    %cst_127 = arith.constant -1.000000e+30 : f32
    %324 = vector.broadcast %cst_127 : f32 to vector<16x16xf32>
    %325 = arith.select %64, %323, %324 : vector<16x16xi1>, vector<16x16xf32>
    %cst_128 = arith.constant dense<0xFF800000> : vector<16xf32>
    %326 = vector.multi_reduction <maximumf>, %325, %cst_128 [1] : vector<16x16xf32> to vector<16xf32>
    %327 = vector.shape_cast %326 : vector<16xf32> to vector<16x1xf32>
    %328 = vector.broadcast %327 : vector<16x1xf32> to vector<16x16xf32>
    %329 = arith.subf %325, %328 : vector<16x16xf32>
    %330 = math.exp %329 : vector<16x16xf32>
    %cst_129 = arith.constant dense<0.000000e+00> : vector<16xf32>
    %331 = vector.multi_reduction <add>, %330, %cst_129 [1] : vector<16x16xf32> to vector<16xf32>
    %332 = vector.shape_cast %331 : vector<16xf32> to vector<16x1xf32>
    %333 = tpu.reciprocal %332 {approx = true} : vector<16x1xf32> -> vector<16x1xf32>
    %334 = vector.broadcast %333 : vector<16x1xf32> to vector<16x16xf32>
    %335 = arith.mulf %330, %334 : vector<16x16xf32>
    %cst_130 = arith.constant dense<0.000000e+00> : vector<16x8xf32>
    %336 = tpu.matmul %335, %320, %cst_130 {dimension_numbers = #tpu.dot_dimension_numbers<[1], [0], [0], [1], [0, 0, 1, 1], [], []>} : vector<16x16xf32>, vector<16x8xf32>, vector<16x8xf32> -> vector<16x8xf32>
    %337 = vector.extract_strided_slice %252 {offsets = [24, 0], sizes = [8, 32], strides = [1, 1]} : vector<32x32xf32> to vector<8x32xf32>
    %cst_131 = arith.constant dense<0.000000e+00> : vector<16x32xf32>
    %338 = tpu.matmul %336, %337, %cst_131 {dimension_numbers = #tpu.dot_dimension_numbers<[1], [0], [0], [1], [0, 0, 1, 1], [], []>} : vector<16x8xf32>, vector<8x32xf32>, vector<16x32xf32> -> vector<16x32xf32>
    %339 = arith.addf %317, %338 : vector<16x32xf32>
    %340 = arith.addf %224, %339 : vector<16x32xf32>
    %c0_132 = arith.constant 0 : index
    %c0_133 = arith.constant 0 : index
    %341 = vector.load %arg21[%c0_132, %c0_133] : memref<1x32xf32, #tpu.memory_space<vmem>>, vector<1x32xf32>
    %342 = vector.broadcast %341 : vector<1x32xf32> to vector<16x32xf32>
    %343 = arith.addf %340, %342 : vector<16x32xf32>
    %c0_134 = arith.constant 0 : index
    %c0_135 = arith.constant 0 : index
    %344 = vector.load %arg22[%c0_134, %c0_135] : memref<1x32xf32, #tpu.memory_space<vmem>>, vector<1x32xf32>
    %c0_136 = arith.constant 0 : index
    %c0_137 = arith.constant 0 : index
    %345 = vector.load %arg23[%c0_136, %c0_137] : memref<1x32xf32, #tpu.memory_space<vmem>>, vector<1x32xf32>
    %cst_138 = arith.constant dense<0.000000e+00> : vector<16xf32>
    %346 = vector.multi_reduction <add>, %343, %cst_138 [1] : vector<16x32xf32> to vector<16xf32>
    %347 = vector.shape_cast %346 : vector<16xf32> to vector<16x1xf32>
    %cst_139 = arith.constant 3.200000e+01 : f32
    %348 = vector.broadcast %cst_139 : f32 to vector<16x1xf32>
    %349 = arith.divf %347, %348 : vector<16x1xf32>
    %350 = vector.broadcast %349 : vector<16x1xf32> to vector<16x32xf32>
    %351 = arith.subf %343, %350 : vector<16x32xf32>
    %352 = arith.mulf %351, %351 : vector<16x32xf32>
    %cst_140 = arith.constant dense<0.000000e+00> : vector<16xf32>
    %353 = vector.multi_reduction <add>, %352, %cst_140 [1] : vector<16x32xf32> to vector<16xf32>
    %354 = vector.shape_cast %353 : vector<16xf32> to vector<16x1xf32>
    %cst_141 = arith.constant 3.200000e+01 : f32
    %355 = vector.broadcast %cst_141 : f32 to vector<16x1xf32>
    %356 = arith.divf %354, %355 : vector<16x1xf32>
    %cst_142 = arith.constant 9.99999974E-6 : f32
    %357 = vector.broadcast %cst_142 : f32 to vector<16x1xf32>
    %358 = arith.addf %356, %357 : vector<16x1xf32>
    %359 = math.rsqrt %358 : vector<16x1xf32>
    %360 = vector.broadcast %359 : vector<16x1xf32> to vector<16x32xf32>
    %361 = arith.mulf %351, %360 : vector<16x32xf32>
    %362 = vector.broadcast %344 : vector<1x32xf32> to vector<16x32xf32>
    %363 = arith.mulf %361, %362 : vector<16x32xf32>
    %364 = vector.broadcast %345 : vector<1x32xf32> to vector<16x32xf32>
    %365 = arith.addf %363, %364 : vector<16x32xf32>
    %c0_143 = arith.constant 0 : index
    %c0_144 = arith.constant 0 : index
    %366 = vector.load %arg24[%c0_143, %c0_144] : memref<32x128xf32, #tpu.memory_space<vmem>>, vector<32x128xf32>
    %cst_145 = arith.constant dense<0.000000e+00> : vector<16x128xf32>
    %367 = tpu.matmul %365, %366, %cst_145 {dimension_numbers = #tpu.dot_dimension_numbers<[1], [0], [0], [1], [0, 0, 1, 1], [], []>} : vector<16x32xf32>, vector<32x128xf32>, vector<16x128xf32> -> vector<16x128xf32>
    %c0_146 = arith.constant 0 : index
    %c0_147 = arith.constant 0 : index
    %368 = vector.load %arg25[%c0_146, %c0_147] : memref<1x128xf32, #tpu.memory_space<vmem>>, vector<1x128xf32>
    %369 = vector.broadcast %368 : vector<1x128xf32> to vector<16x128xf32>
    %370 = arith.addf %367, %369 : vector<16x128xf32>
    %cst_148 = arith.constant 5.000000e-01 : f32
    %371 = vector.broadcast %cst_148 : f32 to vector<16x128xf32>
    %372 = arith.mulf %371, %370 : vector<16x128xf32>
    %cst_149 = arith.constant 0.707106769 : f32
    %373 = vector.broadcast %cst_149 : f32 to vector<16x128xf32>
    %374 = arith.mulf %370, %373 : vector<16x128xf32>
    %375 = math.erf %374 : vector<16x128xf32>
    %cst_150 = arith.constant 1.000000e+00 : f32
    %376 = vector.broadcast %cst_150 : f32 to vector<16x128xf32>
    %377 = arith.addf %376, %375 : vector<16x128xf32>
    %378 = arith.mulf %372, %377 : vector<16x128xf32>
    %c0_151 = arith.constant 0 : index
    %c0_152 = arith.constant 0 : index
    %379 = vector.load %arg26[%c0_151, %c0_152] : memref<128x32xf32, #tpu.memory_space<vmem>>, vector<128x32xf32>
    %cst_153 = arith.constant dense<0.000000e+00> : vector<16x32xf32>
    %380 = tpu.matmul %378, %379, %cst_153 {dimension_numbers = #tpu.dot_dimension_numbers<[1], [0], [0], [1], [0, 0, 1, 1], [], []>} : vector<16x128xf32>, vector<128x32xf32>, vector<16x32xf32> -> vector<16x32xf32>
    %381 = arith.addf %343, %380 : vector<16x32xf32>
    %c0_154 = arith.constant 0 : index
    %c0_155 = arith.constant 0 : index
    %382 = vector.load %arg27[%c0_154, %c0_155] : memref<1x32xf32, #tpu.memory_space<vmem>>, vector<1x32xf32>
    %383 = vector.broadcast %382 : vector<1x32xf32> to vector<16x32xf32>
    %384 = arith.addf %381, %383 : vector<16x32xf32>
    %c0_156 = arith.constant 0 : index
    %c0_157 = arith.constant 0 : index
    %385 = vector.load %arg28[%c0_156, %c0_157] : memref<1x32xf32, #tpu.memory_space<vmem>>, vector<1x32xf32>
    %c0_158 = arith.constant 0 : index
    %c0_159 = arith.constant 0 : index
    %386 = vector.load %arg29[%c0_158, %c0_159] : memref<1x32xf32, #tpu.memory_space<vmem>>, vector<1x32xf32>
    %cst_160 = arith.constant dense<0.000000e+00> : vector<16xf32>
    %387 = vector.multi_reduction <add>, %384, %cst_160 [1] : vector<16x32xf32> to vector<16xf32>
    %388 = vector.shape_cast %387 : vector<16xf32> to vector<16x1xf32>
    %cst_161 = arith.constant 3.200000e+01 : f32
    %389 = vector.broadcast %cst_161 : f32 to vector<16x1xf32>
    %390 = arith.divf %388, %389 : vector<16x1xf32>
    %391 = vector.broadcast %390 : vector<16x1xf32> to vector<16x32xf32>
    %392 = arith.subf %384, %391 : vector<16x32xf32>
    %393 = arith.mulf %392, %392 : vector<16x32xf32>
    %cst_162 = arith.constant dense<0.000000e+00> : vector<16xf32>
    %394 = vector.multi_reduction <add>, %393, %cst_162 [1] : vector<16x32xf32> to vector<16xf32>
    %395 = vector.shape_cast %394 : vector<16xf32> to vector<16x1xf32>
    %cst_163 = arith.constant 3.200000e+01 : f32
    %396 = vector.broadcast %cst_163 : f32 to vector<16x1xf32>
    %397 = arith.divf %395, %396 : vector<16x1xf32>
    %cst_164 = arith.constant 9.99999974E-6 : f32
    %398 = vector.broadcast %cst_164 : f32 to vector<16x1xf32>
    %399 = arith.addf %397, %398 : vector<16x1xf32>
    %400 = math.rsqrt %399 : vector<16x1xf32>
    %401 = vector.broadcast %400 : vector<16x1xf32> to vector<16x32xf32>
    %402 = arith.mulf %392, %401 : vector<16x32xf32>
    %403 = vector.broadcast %385 : vector<1x32xf32> to vector<16x32xf32>
    %404 = arith.mulf %402, %403 : vector<16x32xf32>
    %405 = vector.broadcast %386 : vector<1x32xf32> to vector<16x32xf32>
    %406 = arith.addf %404, %405 : vector<16x32xf32>
    %c0_165 = arith.constant 0 : index
    %c0_166 = arith.constant 0 : index
    %407 = vector.load %arg30[%c0_165, %c0_166] : memref<32x64xf32, #tpu.memory_space<vmem>>, vector<32x64xf32>
    %cst_167 = arith.constant dense<0.000000e+00> : vector<16x64xf32>
    %408 = tpu.matmul %406, %407, %cst_167 {dimension_numbers = #tpu.dot_dimension_numbers<[1], [0], [0], [1], [0, 0, 1, 1], [], []>} : vector<16x32xf32>, vector<32x64xf32>, vector<16x64xf32> -> vector<16x64xf32>
    %c0_168 = arith.constant 0 : index
    %c0_169 = arith.constant 0 : index
    %409 = vector.load %arg31[%c0_168, %c0_169] : memref<1x64xf32, #tpu.memory_space<vmem>>, vector<1x64xf32>
    %410 = vector.broadcast %409 : vector<1x64xf32> to vector<16x64xf32>
    %411 = arith.addf %408, %410 : vector<16x64xf32>
    %c0_170 = arith.constant 0 : index
    %c0_171 = arith.constant 0 : index
    %412 = vector.load %arg32[%c0_170, %c0_171] : memref<16x64xf32, #tpu.memory_space<vmem>>, vector<16x64xf32>
    tpu.vector_store %arg32[%c0_170, %c0_171], %411 {strides = array<i32>} : memref<16x64xf32, #tpu.memory_space<vmem>>, vector<16x64xf32>,
    return
  }
  func.func @transform_0(%arg0: i32) -> (i32, i32) {
    %c0_i32 = arith.constant 0 : i32
    %c0_i32_0 = arith.constant 0 : i32
    %c0_i32_1 = arith.constant 0 : i32
    return %c0_i32, %c0_i32_0 : i32, i32
  }
  func.func @transform_1(%arg0: i32) -> (i32, i32) {
    %c0_i32 = arith.constant 0 : i32
    %c0_i32_0 = arith.constant 0 : i32
    %c0_i32_1 = arith.constant 0 : i32
    return %c0_i32, %c0_i32_0 : i32, i32
  }
  func.func @transform_2(%arg0: i32) -> (i32, i32) {
    %c0_i32 = arith.constant 0 : i32
    %c0_i32_0 = arith.constant 0 : i32
    %c0_i32_1 = arith.constant 0 : i32
    return %c0_i32, %c0_i32_0 : i32, i32
  }
  func.func @transform_3(%arg0: i32) -> (i32, i32) {
    %c0_i32 = arith.constant 0 : i32
    %c0_i32_0 = arith.constant 0 : i32
    %c0_i32_1 = arith.constant 0 : i32
    return %c0_i32, %c0_i32_0 : i32, i32
  }
  func.func @transform_4(%arg0: i32) -> (i32, i32) {
    %c0_i32 = arith.constant 0 : i32
    %c0_i32_0 = arith.constant 0 : i32
    %c0_i32_1 = arith.constant 0 : i32
    return %c0_i32, %c0_i32_0 : i32, i32
  }
  func.func @transform_5(%arg0: i32) -> (i32, i32) {
    %c0_i32 = arith.constant 0 : i32
    %c0_i32_0 = arith.constant 0 : i32
    %c0_i32_1 = arith.constant 0 : i32
    return %c0_i32, %c0_i32_0 : i32, i32
  }
  func.func @transform_6(%arg0: i32) -> (i32, i32) {
    %c0_i32 = arith.constant 0 : i32
    %c0_i32_0 = arith.constant 0 : i32
    %c0_i32_1 = arith.constant 0 : i32
    return %c0_i32, %c0_i32_0 : i32, i32
  }
  func.func @transform_7(%arg0: i32) -> (i32, i32) {
    %c0_i32 = arith.constant 0 : i32
    %c0_i32_0 = arith.constant 0 : i32
    %c0_i32_1 = arith.constant 0 : i32
    return %c0_i32, %c0_i32_0 : i32, i32
  }
  func.func @transform_8(%arg0: i32) -> (i32, i32) {
    %c0_i32 = arith.constant 0 : i32
    %c0_i32_0 = arith.constant 0 : i32
    %c0_i32_1 = arith.constant 0 : i32
    return %c0_i32, %c0_i32_0 : i32, i32
  }
  func.func @transform_9(%arg0: i32) -> (i32, i32) {
    %c0_i32 = arith.constant 0 : i32
    %c0_i32_0 = arith.constant 0 : i32
    %c0_i32_1 = arith.constant 0 : i32
    return %c0_i32, %c0_i32_0 : i32, i32
  }
  func.func @transform_10(%arg0: i32) -> (i32, i32) {
    %c0_i32 = arith.constant 0 : i32
    %c0_i32_0 = arith.constant 0 : i32
    %c0_i32_1 = arith.constant 0 : i32
    return %c0_i32, %c0_i32_0 : i32, i32
  }
  func.func @transform_11(%arg0: i32) -> (i32, i32) {
    %c0_i32 = arith.constant 0 : i32
    %c0_i32_0 = arith.constant 0 : i32
    %c0_i32_1 = arith.constant 0 : i32
    return %c0_i32, %c0_i32_0 : i32, i32
  }
  func.func @transform_12(%arg0: i32) -> (i32, i32) {
    %c0_i32 = arith.constant 0 : i32
    %c0_i32_0 = arith.constant 0 : i32
    %c0_i32_1 = arith.constant 0 : i32
    return %c0_i32, %c0_i32_0 : i32, i32
  }
  func.func @transform_13(%arg0: i32) -> (i32, i32) {
    %c0_i32 = arith.constant 0 : i32
    %c0_i32_0 = arith.constant 0 : i32
    %c0_i32_1 = arith.constant 0 : i32
    return %c0_i32, %c0_i32_0 : i32, i32
  }
  func.func @transform_14(%arg0: i32) -> (i32, i32) {
    %c0_i32 = arith.constant 0 : i32
    %c0_i32_0 = arith.constant 0 : i32
    %c0_i32_1 = arith.constant 0 : i32
    return %c0_i32, %c0_i32_0 : i32, i32
  }
  func.func @transform_15(%arg0: i32) -> (i32, i32) {
    %c0_i32 = arith.constant 0 : i32
    %c0_i32_0 = arith.constant 0 : i32
    %c0_i32_1 = arith.constant 0 : i32
    return %c0_i32, %c0_i32_0 : i32, i32
  }
  func.func @transform_16(%arg0: i32) -> (i32, i32) {
    %c0_i32 = arith.constant 0 : i32
    %c0_i32_0 = arith.constant 0 : i32
    %c0_i32_1 = arith.constant 0 : i32
    return %c0_i32, %c0_i32_0 : i32, i32
  }
  func.func @transform_17(%arg0: i32) -> (i32, i32) {
    %c0_i32 = arith.constant 0 : i32
    %c0_i32_0 = arith.constant 0 : i32
    %c0_i32_1 = arith.constant 0 : i32
    return %c0_i32, %c0_i32_0 : i32, i32
  }
  func.func @transform_18(%arg0: i32) -> (i32, i32) {
    %c0_i32 = arith.constant 0 : i32
    %c0_i32_0 = arith.constant 0 : i32
    %c0_i32_1 = arith.constant 0 : i32
    return %c0_i32, %c0_i32_0 : i32, i32
  }
  func.func @transform_19(%arg0: i32) -> (i32, i32) {
    %c0_i32 = arith.constant 0 : i32
    %c0_i32_0 = arith.constant 0 : i32
    %c0_i32_1 = arith.constant 0 : i32
    return %c0_i32, %c0_i32_0 : i32, i32
  }
  func.func @transform_20(%arg0: i32) -> (i32, i32) {
    %c0_i32 = arith.constant 0 : i32
    %c0_i32_0 = arith.constant 0 : i32
    %c0_i32_1 = arith.constant 0 : i32
    return %c0_i32, %c0_i32_0 : i32, i32
  }
  func.func @transform_21(%arg0: i32) -> (i32, i32) {
    %c0_i32 = arith.constant 0 : i32
    %c0_i32_0 = arith.constant 0 : i32
    %c0_i32_1 = arith.constant 0 : i32
    return %c0_i32, %c0_i32_0 : i32, i32
  }
  func.func @transform_22(%arg0: i32) -> (i32, i32) {
    %c0_i32 = arith.constant 0 : i32
    %c0_i32_0 = arith.constant 0 : i32
    %c0_i32_1 = arith.constant 0 : i32
    return %c0_i32, %c0_i32_0 : i32, i32
  }
  func.func @transform_23(%arg0: i32) -> (i32, i32) {
    %c0_i32 = arith.constant 0 : i32
    %c0_i32_0 = arith.constant 0 : i32
    %c0_i32_1 = arith.constant 0 : i32
    return %c0_i32, %c0_i32_0 : i32, i32
  }
  func.func @transform_24(%arg0: i32) -> (i32, i32) {
    %c0_i32 = arith.constant 0 : i32
    %c0_i32_0 = arith.constant 0 : i32
    %c0_i32_1 = arith.constant 0 : i32
    return %c0_i32, %c0_i32_0 : i32, i32
  }
  func.func @transform_25(%arg0: i32) -> (i32, i32) {
    %c0_i32 = arith.constant 0 : i32
    %c0_i32_0 = arith.constant 0 : i32
    %c0_i32_1 = arith.constant 0 : i32
    return %c0_i32, %c0_i32_0 : i32, i32
  }
  func.func @transform_26(%arg0: i32) -> (i32, i32) {
    %c0_i32 = arith.constant 0 : i32
    %c0_i32_0 = arith.constant 0 : i32
    %c0_i32_1 = arith.constant 0 : i32
    return %c0_i32, %c0_i32_0 : i32, i32
  }
  func.func @transform_27(%arg0: i32) -> (i32, i32) {
    %c0_i32 = arith.constant 0 : i32
    %c0_i32_0 = arith.constant 0 : i32
    %c0_i32_1 = arith.constant 0 : i32
    return %c0_i32, %c0_i32_0 : i32, i32
  }
  func.func @transform_28(%arg0: i32) -> (i32, i32) {
    %c0_i32 = arith.constant 0 : i32
    %c0_i32_0 = arith.constant 0 : i32
    %c0_i32_1 = arith.constant 0 : i32
    return %c0_i32, %c0_i32_0 : i32, i32
  }
  func.func @transform_29(%arg0: i32) -> (i32, i32) {
    %c0_i32 = arith.constant 0 : i32
    %c0_i32_0 = arith.constant 0 : i32
    %c0_i32_1 = arith.constant 0 : i32
    return %c0_i32, %c0_i32_0 : i32, i32
  }
  func.func @transform_30(%arg0: i32) -> (i32, i32) {
    %c0_i32 = arith.constant 0 : i32
    %c0_i32_0 = arith.constant 0 : i32
    %c0_i32_1 = arith.constant 0 : i32
    return %c0_i32, %c0_i32_0 : i32, i32
  }
  func.func @transform_31(%arg0: i32) -> (i32, i32) {
    %c0_i32 = arith.constant 0 : i32
    %c0_i32_0 = arith.constant 0 : i32
    %c0_i32_1 = arith.constant 0 : i32
    return %c0_i32, %c0_i32_0 : i32, i32
  }
}

</mosaic_0001>

<bundles_post_ra>
// kernel: transformer_forward.1
= control target key start
LH: loop header
LB: loop body
LE: loop exit
PB: predicated region body
PF: predicated region fallthrough
CT: control target
= control target key end

     0   :  { %s4363_s6 = smov 1   ;;  %s4364_s10 = smov 2   ;;  %s5021_s0 = inlined_call_operand.smem [shape: u32[32], index: -1, kind: input, shape index: {}] }
   0x1   :  { %s4418_s5 = sld [smem:[%s5021_s0]]   ;;  %s4365_s14 = smov 3  }
   0x2   :  { %s4423_s9 = sld [smem:[%s5021_s0 + %s4363_s6]]   ;;  %s4366_s18 = smov 4  }
   0x3   :  { %s4428_s13 = sld [smem:[%s5021_s0 + %s4364_s10]]   ;;  %s4367_s22 = smov 5  }
   0x4   :  { %s4433_s17 = sld [smem:[%s5021_s0 + %s4365_s14]]   ;;  %s4368_s26 = smov 6  }
   0x5   :  { %s4438_s21 = sld [smem:[%s5021_s0 + %s4366_s18]]   ;;  %s4369_s30 = smov 7  }
   0x6   :  { %s4443_s25 = sld [smem:[%s5021_s0 + %s4367_s22]]   ;;  %s4370_s4 = smov 8  }
   0x7   :  { %s4448_s29 = sld [smem:[%s5021_s0 + %s4368_s26]]   ;;  %s4371_s10 = smov 9  }
   0x8   :  { %s4453_s3 = sld [smem:[%s5021_s0 + %s4369_s30]]   ;;  %s4372_s15 = smov 10  }
   0x9   :  { %s4458_s8 = sld [smem:[%s5021_s0 + %s4370_s4]]   ;;  %s4373_s20 = smov 11  }
   0xa   :  { %s4463_s14 = sld [smem:[%s5021_s0 + %s4371_s10]]   ;;  %s4374_s26 = smov 12  }
   0xb   :  { %s4468_s19 = sld [smem:[%s5021_s0 + %s4372_s15]]   ;;  %s4375_s1 = smov 13  }
   0xc   :  { %s4473_s24 = sld [smem:[%s5021_s0 + %s4373_s20]]   ;;  %s4376_s7 = smov 14  }
   0xd   :  { %s4478_s30 = sld [smem:[%s5021_s0 + %s4374_s26]]   ;;  %s4377_s15 = smov 15  }
   0xe   :  { %s4483_s6 = sld [smem:[%s5021_s0 + %s4375_s1]]   ;;  %s4378_s22 = smov 16  }
   0xf   :  { %s4488_s12 = sld [smem:[%s5021_s0 + %s4376_s7]]   ;;  %s4379_s28 = smov 17  }
  0x10   :  { %s4493_s20 = sld [smem:[%s5021_s0 + %s4377_s15]]   ;;  %s4380_s7 = smov 18  }
  0x11   :  { %s4498_s27 = sld [smem:[%s5021_s0 + %s4378_s22]]   ;;  %s4381_s15 = smov 19  }
  0x12   :  { %s4503_s4 = sld [smem:[%s5021_s0 + %s4379_s28]]   ;;  %s4382_s22 = smov 20  }
  0x13   :  { %s4383_s28 = smov 21  }
  0x15   :  { %5026 = sst [smem:[#allocation5_spill]] %s4488_s12 }
  0x16   :  { %5027 = sst [smem:[#allocation6_spill]] %s4493_s20 }
  0x17   :  { %5028 = sst [smem:[#allocation7_spill]] %s4498_s27 }
  0x18   :  { %5029 = sst [smem:[#allocation8_spill]] %s4503_s4 }
  0x19   :  { %s4508_s12 = sld [smem:[%s5021_s0 + %s4380_s7]]   ;;  %s4384_s7 = smov 22  }
  0x1a   :  { %s4513_s20 = sld [smem:[%s5021_s0 + %s4381_s15]]   ;;  %s4385_s15 = smov 23  }
  0x1b   :  { %s4518_s27 = sld [smem:[%s5021_s0 + %s4382_s22]]   ;;  %s4386_s22 = smov 24  }
  0x1c   :  { %s4523_s4 = sld [smem:[%s5021_s0 + %s4383_s28]]   ;;  %s4387_s28 = smov 25  }
  0x1f   :  { %5030 = sst [smem:[#allocation9_spill]] %s4508_s12 }
  0x20   :  { %5031 = sst [smem:[#allocation10_spill]] %s4513_s20 }
  0x21   :  { %5032 = sst [smem:[#allocation11_spill]] %s4518_s27 }
  0x22   :  { %5033 = sst [smem:[#allocation12_spill]] %s4523_s4 }
  0x23   :  { %s4528_s12 = sld [smem:[%s5021_s0 + %s4384_s7]]   ;;  %s4388_s7 = smov 26  }
  0x24   :  { %s4533_s20 = sld [smem:[%s5021_s0 + %s4385_s15]]   ;;  %s4389_s15 = smov 27  }
  0x25   :  { %s4538_s27 = sld [smem:[%s5021_s0 + %s4386_s22]]   ;;  %s4390_s22 = smov 28  }
  0x26   :  { %s4543_s4 = sld [smem:[%s5021_s0 + %s4387_s28]]   ;;  %s4391_s28 = smov 29  }
  0x29   :  { %5034 = sst [smem:[#allocation13_spill]] %s4528_s12 }
  0x2a   :  { %5035 = sst [smem:[#allocation14_spill]] %s4533_s20 }
  0x2b   :  { %5036 = sst [smem:[#allocation15_spill]] %s4538_s27 }
  0x2c   :  { %5037 = sst [smem:[#allocation16_spill]] %s4543_s4 }
  0x2d   :  { %s4548_s12 = sld [smem:[%s5021_s0 + %s4388_s7]]   ;;  %s4392_s7 = smov 30  }
  0x2e   :  { %s4553_s20 = sld [smem:[%s5021_s0 + %s4389_s15]]   ;;  %s4393_s15 = smov 31  }
  0x2f   :  { %s4558_s27 = sld [smem:[%s5021_s0 + %s4390_s22]]  }
  0x30   :  { %s4563_s4 = sld [smem:[%s5021_s0 + %s4391_s28]]  }
  0x33   :  { %5038 = sst [smem:[#allocation17_spill]] %s4548_s12 }
  0x34   :  { %5039 = sst [smem:[#allocation18_spill]] %s4553_s20 }
  0x35   :  { %s4568_s12 = sld [smem:[%s5021_s0 + %s4392_s7]]  }
  0x36   :  { %s4573_s20 = sld [smem:[%s5021_s0 + %s4393_s15]]  }
  0x37   :  { %v131_v0 = vld [vmem:[%s4418_s5] sm:$0xff]  ;;  %v154_v1 = vld [vmem:[%s4423_s9 + $0x38] sm:$0xff]  ;;  %v133_v2 = vlaneseq  ;;  %v4394_v3 = vmov 0   ;;  %v153_v4 = vld [vmem:[%s4423_s9 + $0x30] sm:$0xff] }
  0x38   :  { %4248 = vset.pattern.permute.xlu0 %v4394_v3  ;;  %3905 = vmatprep.subr.mxu1 %v154_v1  ;;  %v152_v5 = vld [vmem:[%s4423_s9 + $0x28] sm:$0xff]  ;;  %v182_v7 = vld [vmem:[%s4428_s13] sm:$0xff] }
  0x39   :  { %136 = vperm.xlu0 %4248, %v131_v0   ;;  %3906 = vmatpush3.msra.mxu1 %v154_v1  ;;  %v4579_v6 = vand.u32 127, %v133_v2  ;;  %v4582_v8 = vshrl.u32 %v133_v2, 7  ;;  %v132_v9 = vld [vmem:[%s4418_s5 + $0x8] sm:$0xff] }
  0x3a   :  { %3907 = vmatprep.subr.mxu1 %v153_v4  ;;  %3900 = vmatprep.subr.mxu0 %v182_v7 }
  0x3b   :  { %68 = vsyncpa [#allocation3], 0  ;;  %3908 = vmatpush3.msra.mxu1 %v153_v4  ;;  %v151_v10 = vld [vmem:[%s4423_s9 + $0x20] sm:$0xff]  ;;  %3901 = vmatpush3.msra.mxu0 %v182_v7  ;;  %vm164_vm0 = vcmp.eq.s32.totalorder %v4579_v6, %v4582_v8  ;;  %vm183_vm1 = vcmask 64512   ;;  %v4395_v11 = vmov 0.0   ;;  %v150_v13 = vld [vmem:[%s4423_s9 + $0x18] sm:$0xff]  ;;  %vm359_vm11 = vcmp.le.s32.totalorder %v4579_v6, %v4582_v8 }
  0x3c   :  { %3909 = vmatprep.subr.mxu1 %v152_v5  ;;  %v168_v12 = vsel %vm164_vm0, 1.0, %v4395_v11  ;;  %v149_v14 = vld [vmem:[%s4423_s9 + $0x10] sm:$0xff]  ;;  %v148_v15 = vld [vmem:[%s4423_s9 + $0x8] sm:$0xff]  ;;  %v147_v16 = vld [vmem:[%s4423_s9] sm:$0xff]  ;;  %vm265_vm2 = vcmask 523264   ;;  %vm365_vm5 = vcmask 261120  }
  0x3d   :  { %139 = vperm.xlu0 %4248, %v132_v9   ;;  %3910 = vmatpush3.msra.mxu1 %v152_v5  ;;  %v412_v39 = vld [vmem:[%s4443_s25 + $0x18] sm:$0xff]  ;;  %v411_v40 = vld [vmem:[%s4443_s25 + $0x10] sm:$0xff]  ;;  %v410_v41 = vld [vmem:[%s4443_s25 + $0x8] sm:$0xff]  ;;  %s4396_s0 = smov 96   ;;  %s4397_s5 = smov 120   ;;  %v157_v7 = vadd.s32 8, %v4582_v8 }
  0x3e   :  { %3911 = vmatprep.subr.mxu1 %v151_v10  ;;  %3902 = vmatprep.mubr.msk.f32.mxu0 %vm183_vm1, %v168_v12  ;;  %v409_v42 = vld [vmem:[%s4443_s25] sm:$0xff]  ;;  %s4398_s9 = smov 88   ;;  %vm352_vm6 = vcmp.ge.s32.totalorder %v4579_v6, 8  ;;  %vm353_vm7 = vcmp.lt.s32.totalorder %v4579_v6, 16  ;;  %vm348_vm10 = vcmp.lt.s32.totalorder %v4579_v6, 8  ;;  %vm598_vm13 = vcmask 130048  }
  0x3f   :  { %3912 = vmatpush3.msra.mxu1 %v151_v10  ;;  %3903 = vmatmul.mubr.msk.f32.vlgmr.msra.gmra.mxu0 %vm183_vm1, %v168_v12  ;;  %v3640_v50 = vld [vmem:[%s4433_s17] ss:$0 sm:$0xff]  ;;  %vm354_vm8 = vmand %vm352_vm6, %vm353_vm7  ;;  %vm360_vm9 = vcmp.le.s32.totalorder %v4579_v6, %v157_v7  ;;  %s4399_s13 = smov 64   ;;  %s4400_s17 = smov 56  }
  0x40   :  { %3913 = vmatprep.subr.mxu1 %v150_v13  ;;  %v3641_v52 = vld [vmem:[%s4438_s21] ss:$0 sm:$0xff]  ;;  %vm4656_vm12 = vmand %vm354_vm8, %vm360_vm9  ;;  %s4401_s21 = smov 80   ;;  %s4402_s25 = smov 112  }
  0x41   :  { %3914 = vmatpush3.msra.mxu1 %v150_v13  ;;  %v3642_v59 = vld [vmem:[%s4448_s29] ss:$0 sm:$0xff]  ;;  %vm4660_vm14 = vmand %vm348_vm10, %vm359_vm11  ;;  %s4403_s29 = smov 72   ;;  %s4404_s22 = smov 104  }
  0x42   :  { %3915 = vmatprep.subr.mxu1 %v149_v14  ;;  %s4405_s23 = smov 48   ;;  %s4406_s26 = smov 40  }
  0x43   :  { %3916 = vmatpush3.msra.mxu1 %v149_v14  ;;  %s5051_s28 = sld [smem:[#allocation14_spill]] }
  0x44   :  { %3917 = vmatprep.subr.mxu1 %v148_v15  ;;  %s5052_s1 = sld [smem:[#allocation16_spill]] }
  0x45   :  { %3918 = vmatpush3.msra.mxu1 %v148_v15  ;;  %s5053_s2 = sld [smem:[#allocation12_spill]] }
  0x46   :  { %3919 = vmatprep.subr.mxu1 %v147_v16  ;;  %s5054_s7 = sld [smem:[#allocation13_spill]] }
  0x47   :  { %3920 = vmatpush3.msra.mxu1 %v147_v16  ;;  %s5055_s10 = sld [smem:[#allocation15_spill]] }
  0x48   :  { %3924 = vmatprep.subr.mxu1 %v412_v39  ;;  %s5056_s11 = sld [smem:[#allocation17_spill]] }
  0x49   :  { %s5057_s15 = sld [smem:[#allocation18_spill]] }
  0xb4   :  { %v137_v17 = vpop.permute.xlu0 %136 }
  0xb5   :  { %vm141_vm3 = vcmp.eq.s32.totalorder %v4579_v6, %v137_v17 }
  0xb6   :  { %v3633_v18 = vsel %vm141_vm3, 1.0, %v4395_v11 }
  0xb7   :  { %3921 = vmatprep.mubr.msk.f32.mxu1 %vm265_vm2, %v3633_v18 }
  0xb8   :  { %v140_v19 = vpop.permute.xlu0 %139 }
  0xb9   :  { %vm142_vm4 = vcmp.eq.s32.totalorder %v4579_v6, %v140_v19 }
  0xba   :  { %v3634_v20 = vsel %vm142_vm4, 1.0, %v4395_v11 }
  0xbb   :  { %3922 = vmatmul.mubr.msk.f32.vlgmr.msra.gmra.mxu1 %vm265_vm2, %v3634_v20 }
  0xbc   :  { %3925 = vmatpush3.msra.mxu1 %v412_v39 }
  0xbd   :  { %3926 = vmatprep.subr.mxu1 %v411_v40 }
  0xbe   :  { %3927 = vmatpush3.msra.mxu1 %v411_v40 }
  0xbf   :  { %3928 = vmatprep.subr.mxu1 %v410_v41 }
  0xc0   :  { %3929 = vmatpush3.msra.mxu1 %v410_v41 }
  0xc1   :  { %3930 = vmatprep.subr.mxu1 %v409_v42 }
  0xc2   :  { %3931 = vmatpush3.msra.mxu1 %v409_v42 }
  0xff   :  { %v3904_v21 = vpop.f32.mrf.mxu0 }
 0x101   :  { %v256_v23 = vpop.f32.mrf.mxu0 }
 0x17b   :  { %v3923_v22 = vpop.f32.mrf.mxu1 }
 0x17c   :  { %v4600_v26 = vadd.f32 %v3923_v22, %v3904_v21 }
 0x17d   :  { %v338_v24 = vpop.f32.mrf.mxu1 }
 0x17e   :  { %v4598_v25 = vadd.f32 %v338_v24, %v256_v23  ;;  %v369_v28 = vsel %vm365_vm5, %v4600_v26, 0.0 }
 0x180   :  { %v366_v27 = vsel %vm365_vm5, %v4598_v25, 0.0 }
 0x181   :  { %367 = vadd.xlane.f32.xlu1 %v366_v27 }
 0x185   :  { %370 = vadd.xlane.f32.xlu1 %v369_v28 }
 0x20a   :  { %v368_v29 = vpop.xlane.xlu1 %367 }
 0x20b   :  { %v373_v30 = vmul.f32 0.03125, %v368_v29 }
 0x20d   :  { %v375_v31 = vsub.f32 %v4598_v25, %v373_v30 }
 0x20e   :  { %v371_v32 = vpop.xlane.xlu1 %370 }
 0x20f   :  { %v374_v33 = vmul.f32 0.03125, %v371_v32  ;;  %v377_v34 = vmul.f32 %v375_v31, %v375_v31 }
 0x211   :  { %v376_v35 = vsub.f32 %v4600_v26, %v374_v33  ;;  %v379_v36 = vsel %vm365_vm5, %v377_v34, 0.0 }
 0x212   :  { %380 = vadd.xlane.f32.xlu0 %v379_v36 }
 0x213   :  { %v378_v37 = vmul.f32 %v376_v35, %v376_v35 }
 0x215   :  { %v382_v38 = vsel %vm365_vm5, %v378_v37, 0.0 }
 0x216   :  { %383 = vadd.xlane.f32.xlu1 %v382_v38 }
 0x29b   :  { %v381_v43 = vpop.xlane.xlu0 %380 }
 0x29c   :  { %v385_v44 = vmul.f32 0.03125, %v381_v43 }
 0x29e   :  { %v387_v45 = vadd.f32 1e-05, %v385_v44 }
 0x29f   :  { %v384_v46 = vpop.xlane.xlu1 %383 }
 0x2a0   :  { %4249 = vrsqrt.f32 %v387_v45  ;;  %v386_v47 = vmul.f32 0.03125, %v384_v46 }
 0x2a2   :  { %v388_v48 = vadd.f32 1e-05, %v386_v47 }
 0x2a4   :  { %4251 = vrsqrt.f32 %v388_v48 }
 0x2ad   :  { %v4250_v49 = vpop.eup %4249 }
 0x2ae   :  { %v391_v51 = vmul.f32 %v4250_v49, %v375_v31 }
 0x2b0   :  { %v399_v53 = vmul.f32 %v3640_v50, %v391_v51 }
 0x2b1   :  { %v4252_v54 = vpop.eup %4251 }
 0x2b2   :  { %v392_v55 = vmul.f32 %v4252_v54, %v376_v35  ;;  %v407_v56 = vadd.f32 %v3641_v52, %v399_v53 }
 0x2b4   :  { %v400_v57 = vmul.f32 %v3640_v50, %v392_v55  ;;  %3932 = vmatprep.mubr.msk.f32.mxu1 %vm365_vm5, %v407_v56 }
 0x2b6   :  { %v408_v58 = vadd.f32 %v3641_v52, %v400_v57 }
 0x2b8   :  { %3933 = vmatmul.mubr.msk.f32.vlgmr.msra.gmra.mxu1 %vm365_vm5, %v408_v58 }
 0x378   :  { %v3934_v60 = vpop.f32.mrf.mxu1 }
 0x379   :  { %v4619_v61 = vadd.f32 %v3934_v60, %v3642_v59 }
 0x37a   :  { %v492_v62 = vpop.f32.mrf.mxu1 }
 0x37b   :  { %v4621_v63 = vadd.f32 %v3642_v59, %v492_v62  ;;  %509 = vrot.lane.b32.xlu1 %v4619_v61, %s4396_s0  ;;  %v502_v59 = vld [vmem:[%s4453_s3 + $0x8] sm:$0xff] }
 0x37d   :  { %708 = vrot.lane.b32.xlu0 %v4621_v63, %s4397_s5  ;;  %3939 = vmatprep.mubr.msk.f32.mxu0 %vm183_vm1, %v4621_v63 }
 0x37f   :  { %507 = vrot.lane.b32.xlu1 %v4621_v63, %s4396_s0 }
 0x383   :  { %714 = vrot.lane.b32.xlu1 %v4619_v61, %s4398_s9 }
 0x387   :  { %712 = vrot.lane.b32.xlu1 %v4621_v63, %s4398_s9 }
 0x38b   :  { %710 = vrot.lane.b32.xlu1 %v4619_v61, %s4397_s5 }
 0x3ed   :  { %v510_v0 = vpop.permute.xlu1 %509 }
 0x3ee   :  { %3935 = vmatprep.subr.msk.mxu0 %vm183_vm1, %v510_v0 }
 0x3ef   :  { %3936 = vmatpush3.xpose.msk.msra.mxu0 %vm183_vm1, %v510_v0  ;;  %v709_v3 = vpop.permute.xlu0 %708 }
 0x3f1   :  { %v508_v1 = vpop.permute.xlu1 %507 }
 0x3f2   :  { %3937 = vmatprep.subr.msk.mxu0 %vm183_vm1, %v508_v1 }
 0x3f3   :  { %3938 = vmatpush3.xpose.msk.msra.mxu0 %vm183_vm1, %v508_v1 }
 0x3f5   :  { %v715_v2 = vpop.permute.xlu1 %714 }
 0x3f6   :  { %3940 = vmatmul.mubr.msk.f32.vlgmr.msra.gmra.mxu0 %vm183_vm1, %v4619_v61  ;;  %3949 = vmatprep.subr.msk.mxu0 %vm183_vm1, %v715_v2 }
 0x3f7   :  { %3950 = vmatpush3.xpose.msk.msra.mxu0 %vm183_vm1, %v715_v2  ;;  %3953 = vmatprep.mubr.msk.f32.mxu0 %vm183_vm1, %v709_v3  ;;  %v501_v3 = vld [vmem:[%s4453_s3] sm:$0xff] }
 0x3f9   :  { %v713_v4 = vpop.permute.xlu1 %712 }
 0x3fa   :  { %3951 = vmatprep.subr.msk.mxu0 %vm183_vm1, %v713_v4 }
 0x3fb   :  { %3952 = vmatpush3.xpose.msk.msra.mxu0 %vm183_vm1, %v713_v4 }
 0x3fc   :  { %3968 = vmatprep.subr.mxu0 %v501_v3 }
 0x3fd   :  { %v711_v5 = vpop.permute.xlu1 %710 }
 0x3fe   :  { %3954 = vmatmul.mubr.msk.f32.vlgmr.msra.gmra.mxu0 %vm183_vm1, %v711_v5 }
 0x3ff   :  { %3969 = vmatpush3.msra.mxu0 %v501_v3 }
 0x4b6   :  { %v3941_v10 = vpop.f32.mrf.mxu0 }
 0x4b7   :  { %v595_v11 = vmul.f32 0.35355338, %v3941_v10 }
 0x4b8   :  { %v585_v13 = vpop.f32.mrf.mxu0 }
 0x4b9   :  { %v594_v14 = vmul.f32 0.35355338, %v585_v13  ;;  %v597_v15 = vsel %vm4656_vm12, %v595_v11, -1e+30 }
 0x4ba   :  { %v602_v16 = vsel %vm598_vm13, %v597_v15, -inf }
 0x4bb   :  { %603 = vmax.xlane.f32.xlu0 %v602_v16  ;;  %v596_v6 = vsel %vm4660_vm14, %v594_v14, -1e+30 }
 0x4bc   :  { %v599_v8 = vsel %vm598_vm13, %v596_v6, -inf }
 0x4bd   :  { %600 = vmax.xlane.f32.xlu1 %v599_v8 }
 0x4be   :  { %v3955_v17 = vpop.f32.mrf.mxu0 }
 0x4bf   :  { %v800_v18 = vmul.f32 0.35355338, %v3955_v17 }
 0x4c0   :  { %v790_v19 = vpop.f32.mrf.mxu0 }
 0x4c1   :  { %v799_v20 = vmul.f32 0.35355338, %v790_v19  ;;  %v802_v21 = vsel %vm4656_vm12, %v800_v18, -1e+30 }
 0x4c2   :  { %v806_v22 = vsel %vm598_vm13, %v802_v21, -inf }
 0x4c3   :  { %807 = vmax.xlane.f32.xlu1 %v806_v22  ;;  %v801_v23 = vsel %vm4660_vm14, %v799_v20, -1e+30 }
 0x4c4   :  { %v803_v24 = vsel %vm598_vm13, %v801_v23, -inf }
 0x4c7   :  { %804 = vmax.xlane.f32.xlu1 %v803_v24 }
 0x4d8   :  { %623 = vrot.lane.b32.xlu1 %v4619_v61, %s4399_s13 }
 0x544   :  { %v604_v27 = vpop.xlane.xlu0 %603 }
 0x545   :  { %v606_v28 = vsub.f32 %v597_v15, %v604_v27 }
 0x546   :  { %v601_v29 = vpop.xlane.xlu1 %600 }
 0x547   :  { %v609_v30 = vmul.f32 1.442695, %v606_v28  ;;  %v605_v31 = vsub.f32 %v596_v6, %v601_v29 }
 0x549   :  { %4253 = vpow2.f32 %v609_v30  ;;  %v607_v32 = vmul.f32 1.442695, %v605_v31 }
 0x54b   :  { %4255 = vpow2.f32 %v607_v32 }
 0x54c   :  { %v808_v33 = vpop.xlane.xlu1 %807 }
 0x54d   :  { %v810_v34 = vsub.f32 %v802_v21, %v808_v33 }
 0x54f   :  { %v813_v35 = vmul.f32 1.442695, %v810_v34 }
 0x550   :  { %v805_v36 = vpop.xlane.xlu1 %804 }
 0x551   :  { %4257 = vpow2.f32 %v813_v35  ;;  %v809_v44 = vsub.f32 %v801_v23, %v805_v36 }
 0x553   :  { %v811_v45 = vmul.f32 1.442695, %v809_v44 }
 0x554   :  { %v624_v37 = vpop.permute.xlu1 %623 }
 0x555   :  { %3942 = vmatprep.subr.mxu1 %v624_v37  ;;  %4259 = vpow2.f32 %v811_v45 }
 0x556   :  { %v4254_v38 = vpop.eup %4253  ;;  %3943 = vmatpush3.msra.mxu1 %v624_v37 }
 0x557   :  { %v614_v39 = vsel %vm598_vm13, %v4254_v38, 0.0 }
 0x558   :  { %v4256_v40 = vpop.eup %4255  ;;  %615 = vadd.xlane.f32.xlu0 %v614_v39 }
 0x559   :  { %v611_v41 = vsel %vm598_vm13, %v4256_v40, 0.0 }
 0x55a   :  { %612 = vadd.xlane.f32.xlu1 %v611_v41 }
 0x55e   :  { %v4258_v42 = vpop.eup %4257 }
 0x55f   :  { %v818_v43 = vsel %vm598_vm13, %v4258_v42, 0.0 }
 0x560   :  { %819 = vadd.xlane.f32.xlu0 %v818_v43 }
 0x562   :  { %v4260_v46 = vpop.eup %4259 }
 0x563   :  { %v815_v47 = vsel %vm598_vm13, %v4260_v46, 0.0 }
 0x56b   :  { %827 = vrot.lane.b32.xlu1 %v4619_v61, %s4400_s17 }
 0x576   :  { %621 = vrot.lane.b32.xlu0 %v4621_v63, %s4399_s13 }
 0x57a   :  { %1080 = vrot.lane.b32.xlu0 %v4619_v61, %s4401_s21 }
 0x57e   :  { %1074 = vrot.lane.b32.xlu0 %v4621_v63, %s4402_s25 }
 0x582   :  { %1367 = vrot.lane.b32.xlu0 %v4619_v61, %s4403_s29 }
 0x586   :  { %1361 = vrot.lane.b32.xlu0 %v4621_v63, %s4404_s22 }
 0x58f   :  { %816 = vadd.xlane.f32.xlu1 %v815_v47 }
 0x5a0   :  { %825 = vrot.lane.b32.xlu1 %v4621_v63, %s4400_s17 }
 0x5a4   :  { %1078 = vrot.lane.b32.xlu1 %v4621_v63, %s4401_s21 }
 0x5a8   :  { %1076 = vrot.lane.b32.xlu1 %v4619_v61, %s4402_s25 }
 0x5ac   :  { %1365 = vrot.lane.b32.xlu1 %v4621_v63, %s4403_s29 }
 0x5b0   :  { %1363 = vrot.lane.b32.xlu1 %v4619_v61, %s4404_s22 }
 0x5e1   :  { %v616_v48 = vpop.xlane.xlu0 %615 }
 0x5e2   :  { %4261 = vrcp.f32 %v616_v48 }
 0x5e3   :  { %v613_v49 = vpop.xlane.xlu1 %612 }
 0x5e4   :  { %4263 = vrcp.f32 %v613_v49 }
 0x5e7   :  { %v828_v52 = vpop.permute.xlu1 %827 }
 0x5e9   :  { %v820_v50 = vpop.xlane.xlu0 %819 }
 0x5ea   :  { %4265 = vrcp.f32 %v820_v50 }
 0x5ed   :  { %v622_v51 = vpop.permute.xlu0 %621 }
 0x5ee   :  { %3944 = vmatprep.subr.mxu1 %v622_v51 }
 0x5ef   :  { %3945 = vmatpush3.msra.mxu1 %v622_v51  ;;  %v4262_v53 = vpop.eup %4261 }
 0x5f0   :  { %3956 = vmatprep.subr.mxu1 %v828_v52  ;;  %v620_v56 = vmul.f32 %v4262_v53, %v4254_v38 }
 0x5f1   :  { %v4264_v54 = vpop.eup %4263  ;;  %v1081_v2 = vpop.permute.xlu0 %1080 }
 0x5f2   :  { %v619_v55 = vmul.f32 %v4264_v54, %v4256_v40 }
 0x5f4   :  { %3946 = vmatprep.mubr.msk.f32.mxu1 %vm598_vm13, %v619_v55 }
 0x5f5   :  { %3947 = vmatmul.mubr.msk.f32.vlgmr.msra.gmra.mxu1 %vm598_vm13, %v620_v56  ;;  %v1075_v7 = vpop.permute.xlu0 %1074 }
 0x5f6   :  { %3957 = vmatpush3.msra.mxu1 %v828_v52 }
 0x5f7   :  { %v4266_v60 = vpop.eup %4265 }
 0x5f8   :  { %v824_v1 = vmul.f32 %v4266_v60, %v4258_v42 }
 0x5f9   :  { %v1368_v14 = vpop.permute.xlu0 %1367 }
 0x5fd   :  { %v1362_v16 = vpop.permute.xlu0 %1361 }
 0x618   :  { %v817_v57 = vpop.xlane.xlu1 %816 }
 0x619   :  { %4267 = vrcp.f32 %v817_v57 }
 0x61c   :  { %v826_v58 = vpop.permute.xlu1 %825 }
 0x61d   :  { %3958 = vmatprep.subr.mxu1 %v826_v58 }
 0x61e   :  { %3959 = vmatpush3.msra.mxu1 %v826_v58  ;;  %v503_v58 = vld [vmem:[%s4453_s3 + $0x10] sm:$0xff] }
 0x61f   :  { %3963 = vmatprep.subr.mxu1 %v502_v59 }
 0x620   :  { %v1079_v11 = vpop.permute.xlu1 %1078 }
 0x624   :  { %v1077_v15 = vpop.permute.xlu1 %1076 }
 0x626   :  { %v4268_v62 = vpop.eup %4267 }
 0x627   :  { %v823_v0 = vmul.f32 %v4268_v62, %v4260_v46 }
 0x628   :  { %v1366_v6 = vpop.permute.xlu1 %1365 }
 0x629   :  { %3960 = vmatprep.mubr.msk.f32.mxu1 %vm598_vm13, %v823_v0 }
 0x62a   :  { %3961 = vmatmul.mubr.msk.f32.vlgmr.msra.gmra.mxu1 %vm598_vm13, %v824_v1 }
 0x62b   :  { %3964 = vmatpush3.msra.mxu1 %v502_v59 }
 0x62c   :  { %3973 = vmatprep.subr.msk.mxu1 %vm183_vm1, %v1081_v2  ;;  %v1364_v8 = vpop.permute.xlu1 %1363 }
 0x6b5   :  { %v3948_v4 = vpop.f32.mrf.mxu1 }
 0x6b7   :  { %v699_v5 = vpop.f32.mrf.mxu1 }
 0x6b8   :  { %3970 = vmatprep.mubr.msk.f32.mxu0 %vm183_vm1, %v699_v5 }
 0x6b9   :  { %3971 = vmatmul.mubr.msk.f32.vlgmr.msra.gmra.mxu0 %vm183_vm1, %v3948_v4 }
 0x6ea   :  { %v3962_v10 = vpop.f32.mrf.mxu1 }
 0x6ec   :  { %v903_v13 = vpop.f32.mrf.mxu1 }
 0x6ed   :  { %3965 = vmatprep.mubr.msk.f32.mxu1 %vm183_vm1, %v903_v13 }
 0x6ee   :  { %3966 = vmatmul.mubr.msk.f32.vlgmr.msra.gmra.mxu1 %vm183_vm1, %v3962_v10 }
 0x6ef   :  { %3974 = vmatpush3.xpose.msk.msra.mxu1 %vm183_vm1, %v1081_v2  ;;  %3977 = vmatprep.mubr.msk.f32.mxu1 %vm183_vm1, %v1075_v7 }
 0x6f0   :  { %3975 = vmatprep.subr.msk.mxu1 %vm183_vm1, %v1079_v11 }
 0x6f3   :  { %3976 = vmatpush3.xpose.msk.msra.mxu1 %vm183_vm1, %v1079_v11 }
 0x6f4   :  { %3992 = vmatprep.subr.msk.mxu1 %vm183_vm1, %v1368_v14 }
 0x6f6   :  { %3978 = vmatmul.mubr.msk.f32.vlgmr.msra.gmra.mxu1 %vm183_vm1, %v1077_v15 }
 0x6f7   :  { %3993 = vmatpush3.xpose.msk.msra.mxu1 %vm183_vm1, %v1368_v14  ;;  %3996 = vmatprep.mubr.msk.f32.mxu1 %vm183_vm1, %v1362_v16 }
 0x6f8   :  { %3994 = vmatprep.subr.msk.mxu1 %vm183_vm1, %v1366_v6 }
 0x6fb   :  { %3995 = vmatpush3.xpose.msk.msra.mxu1 %vm183_vm1, %v1366_v6 }
 0x6fe   :  { %3997 = vmatmul.mubr.msk.f32.vlgmr.msra.gmra.mxu1 %vm183_vm1, %v1364_v8 }
 0x779   :  { %v3972_v17 = vpop.f32.mrf.mxu0 }
 0x77b   :  { %v1065_v10 = vpop.f32.mrf.mxu0 }
 0x7ae   :  { %v3967_v18 = vpop.f32.mrf.mxu1 }
 0x7af   :  { %v4726_v19 = vadd.f32 %v3972_v17, %v3967_v18  ;;  %v504_v17 = vld [vmem:[%s4453_s3 + $0x18] sm:$0xff]  ;;  %s5044_s3 = sld [smem:[#allocation5_spill]] }
 0x7b0   :  { %v4728_v20 = vpop.f32.mrf.mxu1 }
 0x7b6   :  { %v3979_v21 = vpop.f32.mrf.mxu1 }
 0x7b7   :  { %v1166_v22 = vmul.f32 0.35355338, %v3979_v21  ;;  %v1066_v21 = vadd.f32 %v1065_v10, %v4728_v20  ;;  %v1816_v10 = vld [vmem:[%s4483_s6 + $0x58] sm:$0xff] }
 0x7b8   :  { %v1156_v23 = vpop.f32.mrf.mxu1 }
 0x7b9   :  { %v1165_v24 = vmul.f32 0.35355338, %v1156_v23  ;;  %v1168_v27 = vsel %vm4656_vm12, %v1166_v22, -1e+30 }
 0x7ba   :  { %v1172_v28 = vsel %vm598_vm13, %v1168_v27, -inf }
 0x7bb   :  { %1173 = vmax.xlane.f32.xlu1 %v1172_v28  ;;  %v1167_v29 = vsel %vm4660_vm14, %v1165_v24, -1e+30 }
 0x7bc   :  { %v1169_v30 = vsel %vm598_vm13, %v1167_v29, -inf }
 0x7bd   :  { %1170 = vmax.xlane.f32.xlu0 %v1169_v30 }
 0x7be   :  { %v3998_v31 = vpop.f32.mrf.mxu1 }
 0x7bf   :  { %v1453_v50 = vmul.f32 0.35355338, %v3998_v31  ;;  %v3677_v31 = vld [vmem:[%s4458_s8] ss:$0 sm:$0xff]  ;;  %s5045_s8 = sld [smem:[#allocation8_spill]] }
 0x7c0   :  { %v1443_v32 = vpop.f32.mrf.mxu1 }
 0x7c1   :  { %v1452_v33 = vmul.f32 0.35355338, %v1443_v32  ;;  %v1455_v53 = vsel %vm4656_vm12, %v1453_v50, -1e+30  ;;  %v1820_v50 = vld [vmem:[%s4483_s6 + $0x78] sm:$0xff] }
 0x7c2   :  { %v1459_v54 = vsel %vm598_vm13, %v1455_v53, -inf }
 0x7c3   :  { %v1454_v34 = vsel %vm4660_vm14, %v1452_v33, -1e+30 }
 0x7c4   :  { %v1456_v35 = vsel %vm598_vm13, %v1454_v34, -inf }
 0x7cc   :  { %1193 = vrot.lane.b32.xlu1 %v4619_v61, %s4405_s23 }
 0x7f0   :  { %1457 = vmax.xlane.f32.xlu1 %v1456_v35 }
 0x844   :  { %v1174_v36 = vpop.xlane.xlu1 %1173 }
 0x845   :  { %v1176_v37 = vsub.f32 %v1168_v27, %v1174_v36 }
 0x846   :  { %v1171_v38 = vpop.xlane.xlu0 %1170 }
 0x847   :  { %v1179_v39 = vmul.f32 1.442695, %v1176_v37  ;;  %v1175_v40 = vsub.f32 %v1167_v29, %v1171_v38 }
 0x848   :  { %v1194_v41 = vpop.permute.xlu1 %1193 }
 0x849   :  { %4269 = vpow2.f32 %v1179_v39  ;;  %v1177_v42 = vmul.f32 1.442695, %v1175_v40  ;;  %3980 = vmatprep.subr.mxu0 %v1194_v41 }
 0x84a   :  { %3981 = vmatpush3.msra.mxu0 %v1194_v41 }
 0x84b   :  { %4271 = vpow2.f32 %v1177_v42 }
 0x856   :  { %v4270_v43 = vpop.eup %4269 }
 0x857   :  { %v1184_v44 = vsel %vm598_vm13, %v4270_v43, 0.0 }
 0x858   :  { %v4272_v45 = vpop.eup %4271  ;;  %1185 = vadd.xlane.f32.xlu0 %v1184_v44 }
 0x859   :  { %v1181_v46 = vsel %vm598_vm13, %v4272_v45, 0.0 }
 0x85c   :  { %1182 = vadd.xlane.f32.xlu0 %v1181_v46  ;;  %v1706_v46 = vld [vmem:[%s4473_s24 + $0x18] sm:$0xff] }
 0x85d   :  { %4011 = vmatprep.subr.mxu1 %v1706_v46 }
 0x85e   :  { %4012 = vmatpush3.msra.mxu1 %v1706_v46 }
 0x872   :  { %1191 = vrot.lane.b32.xlu0 %v4621_v63, %s4405_s23 }
 0x879   :  { %v1458_v47 = vpop.xlane.xlu1 %1457 }
 0x87a   :  { %v1462_v48 = vsub.f32 %v1454_v34, %v1458_v47  ;;  %v1705_v47 = vld [vmem:[%s4473_s24 + $0x10] sm:$0xff] }
 0x87b   :  { %4013 = vmatprep.subr.mxu1 %v1705_v47 }
 0x87c   :  { %v1464_v49 = vmul.f32 1.442695, %v1462_v48  ;;  %v1704_v48 = vld [vmem:[%s4473_s24 + $0x8] sm:$0xff]  ;;  %4014 = vmatpush3.msra.mxu1 %v1705_v47 }
 0x87d   :  { %4015 = vmatprep.subr.mxu1 %v1704_v48 }
 0x87e   :  { %4273 = vpow2.f32 %v1464_v49  ;;  %v1703_v49 = vld [vmem:[%s4473_s24] sm:$0xff]  ;;  %4016 = vmatpush3.msra.mxu1 %v1704_v48  ;;  %s5048_s24 = sld [smem:[#allocation9_spill]] }
 0x87f   :  { %4017 = vmatprep.subr.mxu1 %v1703_v49 }
 0x880   :  { %4018 = vmatpush3.msra.mxu1 %v1703_v49 }
 0x88b   :  { %v4274_v51 = vpop.eup %4273 }
 0x88c   :  { %v1468_v52 = vsel %vm598_vm13, %v4274_v51, 0.0 }
 0x88d   :  { %1469 = vadd.xlane.f32.xlu1 %v1468_v52  ;;  %v1818_v52 = vld [vmem:[%s4483_s6 + $0x68] sm:$0xff] }
 0x891   :  { %1460 = vmax.xlane.f32.xlu0 %v1459_v54 }
 0x89e   :  { %1480 = vrot.lane.b32.xlu1 %v4619_v61, %s4406_s26 }
 0x8e1   :  { %v1186_v55 = vpop.xlane.xlu0 %1185 }
 0x8e2   :  { %4275 = vrcp.f32 %v1186_v55 }
 0x8e5   :  { %v1183_v56 = vpop.xlane.xlu0 %1182 }
 0x8e6   :  { %4277 = vrcp.f32 %v1183_v56 }
 0x8e9   :  { %v1192_v57 = vpop.permute.xlu0 %1191 }
 0x8ea   :  { %3982 = vmatprep.subr.mxu0 %v1192_v57 }
 0x8eb   :  { %3983 = vmatpush3.msra.mxu0 %v1192_v57 }
 0x8ec   :  { %3987 = vmatprep.subr.mxu0 %v503_v58 }
 0x8ef   :  { %v4276_v59 = vpop.eup %4275 }
 0x8f0   :  { %v1190_v0 = vmul.f32 %v4276_v59, %v4270_v43 }
 0x8f3   :  { %v4278_v60 = vpop.eup %4277 }
 0x8f4   :  { %v1189_v62 = vmul.f32 %v4278_v60, %v4272_v45  ;;  %v3678_v60 = vld [vmem:[%s4463_s14] ss:$0 sm:$0xff]  ;;  %s5046_s14 = sld [smem:[#allocation6_spill]] }
 0x8f6   :  { %3984 = vmatprep.mubr.msk.f32.mxu0 %vm598_vm13, %v1189_v62 }
 0x8f7   :  { %3985 = vmatmul.mubr.msk.f32.vlgmr.msra.gmra.mxu0 %vm598_vm13, %v1190_v0 }
 0x8f8   :  { %3988 = vmatpush3.msra.mxu0 %v503_v58 }
 0x916   :  { %v1470_v1 = vpop.xlane.xlu1 %1469 }
 0x91a   :  { %v1461_v61 = vpop.xlane.xlu0 %1460  ;;  %v1481_v2 = vpop.permute.xlu1 %1480 }
 0x91b   :  { %v1463_v3 = vsub.f32 %v1455_v53, %v1461_v61  ;;  %3999 = vmatprep.subr.mxu0 %v1481_v2 }
 0x91d   :  { %v1466_v4 = vmul.f32 1.442695, %v1463_v3 }
 0x91f   :  { %4279 = vpow2.f32 %v1466_v4 }
 0x920   :  { %4281 = vrcp.f32 %v1470_v1 }
 0x92c   :  { %v4280_v5 = vpop.eup %4279 }
 0x92d   :  { %v1471_v7 = vsel %vm598_vm13, %v4280_v5, 0.0  ;;  %v4282_v11 = vpop.eup %4281 }
 0x92e   :  { %1472 = vadd.xlane.f32.xlu0 %v1471_v7  ;;  %v1476_v16 = vmul.f32 %v4282_v11, %v4274_v51  ;;  %v1819_v51 = vld [vmem:[%s4483_s6 + $0x70] sm:$0xff]  ;;  %v1817_v7 = vld [vmem:[%s4483_s6 + $0x60] sm:$0xff] }
 0x92f   :  { %v1815_v11 = vld [vmem:[%s4483_s6 + $0x50] sm:$0xff] }
 0x944   :  { %1478 = vrot.lane.b32.xlu0 %v4621_v63, %s4406_s26 }
 0x9b7   :  { %v1473_v13 = vpop.xlane.xlu0 %1472  ;;  %v3986_v14 = vpop.f32.mrf.mxu0 }
 0x9b8   :  { %4283 = vrcp.f32 %v1473_v13  ;;  %v1814_v13 = vld [vmem:[%s4483_s6 + $0x48] sm:$0xff] }
 0x9b9   :  { %v1269_v15 = vpop.f32.mrf.mxu0 }
 0x9ba   :  { %3989 = vmatprep.mubr.msk.f32.mxu0 %vm183_vm1, %v1269_v15  ;;  %v1812_v15 = vld [vmem:[%s4483_s6 + $0x38] sm:$0xff] }
 0x9bb   :  { %v1479_v6 = vpop.permute.xlu0 %1478  ;;  %3990 = vmatmul.mubr.msk.f32.vlgmr.msra.gmra.mxu0 %vm183_vm1, %v3986_v14  ;;  %v1813_v14 = vld [vmem:[%s4483_s6 + $0x40] sm:$0xff] }
 0x9bc   :  { %4000 = vmatpush3.msra.mxu0 %v1481_v2  ;;  %4003 = vmatprep.mubr.msk.f32.mxu0 %vm598_vm13, %v1476_v16  ;;  %v3679_v2 = vld [vmem:[%s4468_s19] ss:$0 sm:$0xff]  ;;  %v1811_v16 = vld [vmem:[%s4483_s6 + $0x30] sm:$0xff]  ;;  %s5047_s19 = sld [smem:[#allocation7_spill]] }
 0x9bd   :  { %4001 = vmatprep.subr.mxu0 %v1479_v6 }
 0x9be   :  { %4002 = vmatpush3.msra.mxu0 %v1479_v6  ;;  %v1810_v6 = vld [vmem:[%s4483_s6 + $0x28] sm:$0xff] }
 0x9bf   :  { %4006 = vmatprep.subr.mxu0 %v504_v17 }
 0x9c5   :  { %v4284_v63 = vpop.eup %4283 }
 0x9c6   :  { %v1477_v8 = vmul.f32 %v4284_v63, %v4280_v5  ;;  %v1809_v63 = vld [vmem:[%s4483_s6 + $0x20] sm:$0xff] }
 0x9c8   :  { %4004 = vmatmul.mubr.msk.f32.vlgmr.msra.gmra.mxu0 %vm598_vm13, %v1477_v8  ;;  %v1808_v8 = vld [vmem:[%s4483_s6 + $0x18] sm:$0xff] }
 0x9c9   :  { %4007 = vmatpush3.msra.mxu0 %v504_v17  ;;  %v1807_v17 = vld [vmem:[%s4483_s6 + $0x10] sm:$0xff] }
 0x9ca   :  { %4022 = vmatprep.subr.mxu0 %v1820_v50 }
 0xa7b   :  { %v3991_v18 = vpop.f32.mrf.mxu0 }
 0xa7c   :  { %v1360_v22 = vadd.f32 %v3991_v18, %v4726_v19  ;;  %v1806_v18 = vld [vmem:[%s4483_s6 + $0x8] sm:$0xff] }
 0xa7d   :  { %v1350_v23 = vpop.f32.mrf.mxu0 }
 0xa7e   :  { %v1359_v24 = vadd.f32 %v1350_v23, %v1066_v21  ;;  %v1805_v21 = vld [vmem:[%s4483_s6] sm:$0xff]  ;;  %s5050_s6 = sld [smem:[#allocation11_spill]] }
 0xa88   :  { %v4005_v27 = vpop.f32.mrf.mxu0 }
 0xa8a   :  { %v1556_v28 = vpop.f32.mrf.mxu0 }
 0xa8b   :  { %4008 = vmatprep.mubr.msk.f32.mxu0 %vm183_vm1, %v1556_v28 }
 0xa8c   :  { %4009 = vmatmul.mubr.msk.f32.vlgmr.msra.gmra.mxu0 %vm183_vm1, %v4005_v27 }
 0xa8d   :  { %4023 = vmatpush3.msra.mxu0 %v1820_v50 }
 0xa8e   :  { %4024 = vmatprep.subr.mxu0 %v1819_v51 }
 0xa8f   :  { %4025 = vmatpush3.msra.mxu0 %v1819_v51 }
 0xa90   :  { %4026 = vmatprep.subr.mxu0 %v1818_v52 }
 0xa91   :  { %4027 = vmatpush3.msra.mxu0 %v1818_v52 }
 0xa92   :  { %4028 = vmatprep.subr.mxu0 %v1817_v7 }
 0xa93   :  { %4029 = vmatpush3.msra.mxu0 %v1817_v7 }
 0xa94   :  { %4030 = vmatprep.subr.mxu0 %v1816_v10 }
 0xa95   :  { %4031 = vmatpush3.msra.mxu0 %v1816_v10  ;;  %v3685_v10 = vld [vmem:[%s5047_s19] ss:$0 sm:$0xff] }
 0xa96   :  { %4032 = vmatprep.subr.mxu0 %v1815_v11 }
 0xa97   :  { %4033 = vmatpush3.msra.mxu0 %v1815_v11 }
 0xa98   :  { %4034 = vmatprep.subr.mxu0 %v1814_v13 }
 0xa99   :  { %4035 = vmatpush3.msra.mxu0 %v1814_v13 }
 0xa9a   :  { %4036 = vmatprep.subr.mxu0 %v1813_v14 }
 0xa9b   :  { %4037 = vmatpush3.msra.mxu0 %v1813_v14 }
 0xa9c   :  { %4038 = vmatprep.subr.mxu0 %v1812_v15 }
 0xa9d   :  { %4039 = vmatpush3.msra.mxu0 %v1812_v15  ;;  %v3686_v15 = vld [vmem:[%s5048_s24] ss:$0 sm:$0xff] }
 0xa9e   :  { %4040 = vmatprep.subr.mxu0 %v1811_v16 }
 0xa9f   :  { %4041 = vmatpush3.msra.mxu0 %v1811_v16 }
 0xaa0   :  { %4042 = vmatprep.subr.mxu0 %v1810_v6 }
 0xaa1   :  { %4043 = vmatpush3.msra.mxu0 %v1810_v6 }
 0xaa2   :  { %4044 = vmatprep.subr.mxu0 %v1809_v63 }
 0xaa3   :  { %4045 = vmatpush3.msra.mxu0 %v1809_v63 }
 0xaa4   :  { %4046 = vmatprep.subr.mxu0 %v1808_v8 }
 0xaa5   :  { %4047 = vmatpush3.msra.mxu0 %v1808_v8 }
 0xaa6   :  { %4048 = vmatprep.subr.mxu0 %v1807_v17 }
 0xaa7   :  { %4049 = vmatpush3.msra.mxu0 %v1807_v17 }
 0xaa8   :  { %4050 = vmatprep.subr.mxu0 %v1806_v18 }
 0xaa9   :  { %4051 = vmatpush3.msra.mxu0 %v1806_v18 }
 0xaaa   :  { %4052 = vmatprep.subr.mxu0 %v1805_v21 }
 0xaab   :  { %4053 = vmatpush3.msra.mxu0 %v1805_v21 }
 0xb4c   :  { %v4010_v29 = vpop.f32.mrf.mxu0 }
 0xb4d   :  { %v1647_v30 = vadd.f32 %v4010_v29, %v1360_v22  ;;  %v3680_v22 = vld [vmem:[%s4478_s30] ss:$0 sm:$0xff]  ;;  %s5049_s30 = sld [smem:[#allocation10_spill]] }
 0xb4e   :  { %v1637_v32 = vpop.f32.mrf.mxu0 }
 0xb4f   :  { %v1649_v33 = vadd.f32 %v1647_v30, %v4600_v26  ;;  %v1646_v34 = vadd.f32 %v1637_v32, %v1359_v24 }
 0xb51   :  { %v4768_v35 = vadd.f32 %v3677_v31, %v1649_v33  ;;  %v1648_v20 = vadd.f32 %v1646_v34, %v4598_v25 }
 0xb53   :  { %v4771_v19 = vadd.f32 %v3677_v31, %v1648_v20  ;;  %v1664_v36 = vsel %vm365_vm5, %v4768_v35, 0.0 }
 0xb54   :  { %1665 = vadd.xlane.f32.xlu0 %v1664_v36 }
 0xb55   :  { %v1661_v37 = vsel %vm365_vm5, %v4771_v19, 0.0 }
 0xb56   :  { %1662 = vadd.xlane.f32.xlu1 %v1661_v37 }
 0xbdd   :  { %v1666_v38 = vpop.xlane.xlu0 %1665 }
 0xbde   :  { %v1668_v26 = vmul.f32 0.03125, %v1666_v38 }
 0xbdf   :  { %v1663_v39 = vpop.xlane.xlu1 %1662 }
 0xbe0   :  { %v1670_v40 = vsub.f32 %v4768_v35, %v1668_v26  ;;  %v1667_v25 = vmul.f32 0.03125, %v1663_v39  ;;  %v3683_v39 = vld [vmem:[%s5044_s3] ss:$0 sm:$0xff] }
 0xbe2   :  { %v1669_v41 = vsub.f32 %v4771_v19, %v1667_v25  ;;  %v1672_v42 = vmul.f32 %v1670_v40, %v1670_v40 }
 0xbe4   :  { %v1676_v43 = vsel %vm365_vm5, %v1672_v42, 0.0  ;;  %v1671_v44 = vmul.f32 %v1669_v41, %v1669_v41 }
 0xbe5   :  { %1677 = vadd.xlane.f32.xlu0 %v1676_v43 }
 0xbe6   :  { %v1673_v45 = vsel %vm365_vm5, %v1671_v44, 0.0 }
 0xbe7   :  { %1674 = vadd.xlane.f32.xlu1 %v1673_v45 }
 0xc6e   :  { %v1678_v53 = vpop.xlane.xlu0 %1677 }
 0xc6f   :  { %v1680_v54 = vmul.f32 0.03125, %v1678_v53 }
 0xc70   :  { %v1675_v55 = vpop.xlane.xlu1 %1674 }
 0xc71   :  { %v1682_v56 = vadd.f32 1e-05, %v1680_v54  ;;  %v1679_v57 = vmul.f32 0.03125, %v1675_v55  ;;  %v1954_v54 = vld [vmem:[%s5045_s8 + $0x18] sm:$0xff]  ;;  %v1953_v55 = vld [vmem:[%s5045_s8 + $0x10] sm:$0xff] }
 0xc72   :  { %4057 = vmatprep.subr.mxu1 %v1954_v54 }
 0xc73   :  { %4285 = vrsqrt.f32 %v1682_v56  ;;  %v1681_v58 = vadd.f32 1e-05, %v1679_v57  ;;  %v1952_v56 = vld [vmem:[%s5045_s8 + $0x8] sm:$0xff]  ;;  %v1951_v57 = vld [vmem:[%s5045_s8] sm:$0xff] }
 0xc75   :  { %4287 = vrsqrt.f32 %v1681_v58 }
 0xc80   :  { %v4286_v59 = vpop.eup %4285 }
 0xc81   :  { %v1686_v62 = vmul.f32 %v4286_v59, %v1670_v40 }
 0xc82   :  { %v4288_v0 = vpop.eup %4287 }
 0xc83   :  { %v1685_v1 = vmul.f32 %v4288_v0, %v1669_v41  ;;  %v1694_v61 = vmul.f32 %v3678_v60, %v1686_v62 }
 0xc85   :  { %v1693_v3 = vmul.f32 %v3678_v60, %v1685_v1  ;;  %v1702_v5 = vadd.f32 %v3679_v2, %v1694_v61 }
 0xc87   :  { %v1701_v4 = vadd.f32 %v3679_v2, %v1693_v3  ;;  %v3684_v2 = vld [vmem:[%s5046_s14] ss:$0 sm:$0xff] }
 0xc89   :  { %4019 = vmatprep.mubr.msk.f32.mxu1 %vm365_vm5, %v1701_v4 }
 0xc8a   :  { %4020 = vmatmul.mubr.msk.f32.vlgmr.msra.gmra.mxu1 %vm365_vm5, %v1702_v5 }
 0xc8b   :  { %4058 = vmatpush3.msra.mxu1 %v1954_v54 }
 0xc8c   :  { %4059 = vmatprep.subr.mxu1 %v1953_v55 }
 0xc8d   :  { %4060 = vmatpush3.msra.mxu1 %v1953_v55 }
 0xc8e   :  { %4061 = vmatprep.subr.mxu1 %v1952_v56 }
 0xc8f   :  { %4062 = vmatpush3.msra.mxu1 %v1952_v56 }
 0xc90   :  { %4063 = vmatprep.subr.mxu1 %v1951_v57 }
 0xc91   :  { %4064 = vmatpush3.msra.mxu1 %v1951_v57 }
 0xd4a   :  { %v4021_v23 = vpop.f32.mrf.mxu1 }
 0xd4b   :  { %v1792_v24 = vadd.f32 %v4021_v23, %v3680_v22 }
 0xd4c   :  { %v1786_v27 = vpop.f32.mrf.mxu1 }
 0xd4d   :  { %v1798_v28 = vmul.f32 0.70710677, %v1792_v24  ;;  %v1787_v29 = vadd.f32 %v3680_v22, %v1786_v27  ;;  %v1796_v36 = vmul.f32 0.5, %v1792_v24 }
 0xd4f   :  { %4289 = verf.f32 %v1798_v28  ;;  %v1797_v30 = vmul.f32 0.70710677, %v1787_v29  ;;  %v1795_v34 = vmul.f32 0.5, %v1787_v29 }
 0xd51   :  { %4291 = verf.f32 %v1797_v30 }
 0xd5c   :  { %v4290_v31 = vpop.eup %4289 }
 0xd5d   :  { %v1802_v33 = vadd.f32 1.0, %v4290_v31 }
 0xd5e   :  { %v4292_v32 = vpop.eup %4291 }
 0xd5f   :  { %v1801_v20 = vadd.f32 1.0, %v4292_v32  ;;  %v1804_v38 = vmul.f32 %v1802_v33, %v1796_v36 }
 0xd61   :  { %v1803_v37 = vmul.f32 %v1801_v20, %v1795_v34 }
 0xd63   :  { %4054 = vmatprep.mubr.f32.mxu0 %v1803_v37 }
 0xd64   :  { %4055 = vmatmul.mubr.f32.vlgmr.msra.gmra.mxu0 %v1804_v38 }
 0xe24   :  { %v4056_v26 = vpop.f32.mrf.mxu0 }
 0xe25   :  { %v1897_v40 = vadd.f32 %v4056_v26, %v4768_v35 }
 0xe26   :  { %v1887_v25 = vpop.f32.mrf.mxu0 }
 0xe27   :  { %v4808_v41 = vadd.f32 %v3683_v39, %v1897_v40  ;;  %v1896_v42 = vadd.f32 %v1887_v25, %v4771_v19 }
 0xe29   :  { %v4811_v43 = vadd.f32 %v3683_v39, %v1896_v42  ;;  %v1912_v44 = vsel %vm365_vm5, %v4808_v41, 0.0 }
 0xe2a   :  { %1913 = vadd.xlane.f32.xlu0 %v1912_v44 }
 0xe2b   :  { %v1909_v45 = vsel %vm365_vm5, %v4811_v43, 0.0 }
 0xe2c   :  { %1910 = vadd.xlane.f32.xlu1 %v1909_v45 }
 0xeb3   :  { %v1914_v46 = vpop.xlane.xlu0 %1913 }
 0xeb4   :  { %v1916_v35 = vmul.f32 0.03125, %v1914_v46 }
 0xeb5   :  { %v1911_v47 = vpop.xlane.xlu1 %1910 }
 0xeb6   :  { %v1918_v48 = vsub.f32 %v4808_v41, %v1916_v35  ;;  %v1915_v19 = vmul.f32 0.03125, %v1911_v47 }
 0xeb8   :  { %v1917_v49 = vsub.f32 %v4811_v43, %v1915_v19  ;;  %v1920_v50 = vmul.f32 %v1918_v48, %v1918_v48 }
 0xeba   :  { %v1924_v51 = vsel %vm365_vm5, %v1920_v50, 0.0  ;;  %v1919_v52 = vmul.f32 %v1917_v49, %v1917_v49 }
 0xebb   :  { %1925 = vadd.xlane.f32.xlu0 %v1924_v51 }
 0xebc   :  { %v1921_v53 = vsel %vm365_vm5, %v1919_v52, 0.0 }
 0xebd   :  { %1922 = vadd.xlane.f32.xlu1 %v1921_v53 }
 0xf44   :  { %v1926_v58 = vpop.xlane.xlu0 %1925 }
 0xf45   :  { %v1928_v59 = vmul.f32 0.03125, %v1926_v58 }
 0xf46   :  { %v1923_v60 = vpop.xlane.xlu1 %1922 }
 0xf47   :  { %v1930_v62 = vadd.f32 1e-05, %v1928_v59  ;;  %v1927_v0 = vmul.f32 0.03125, %v1923_v60 }
 0xf49   :  { %4293 = vrsqrt.f32 %v1930_v62  ;;  %v1929_v1 = vadd.f32 1e-05, %v1927_v0  ;;  %v2044_v62 = vld [vmem:[%s5049_s30 + $0x8] sm:$0xff] }
 0xf4b   :  { %4295 = vrsqrt.f32 %v1929_v1 }
 0xf56   :  { %v4294_v61 = vpop.eup %4293 }
 0xf57   :  { %v1934_v3 = vmul.f32 %v4294_v61, %v1918_v48 }
 0xf58   :  { %v4296_v4 = vpop.eup %4295 }
 0xf59   :  { %v1933_v5 = vmul.f32 %v4296_v4, %v1917_v49  ;;  %v1942_v7 = vmul.f32 %v3684_v2, %v1934_v3 }
 0xf5b   :  { %v1941_v11 = vmul.f32 %v3684_v2, %v1933_v5  ;;  %v1950_v14 = vadd.f32 %v3685_v10, %v1942_v7 }
 0xf5d   :  { %v1949_v13 = vadd.f32 %v3685_v10, %v1941_v11 }
 0xf5f   :  { %4065 = vmatprep.mubr.msk.f32.mxu1 %vm365_vm5, %v1949_v13 }
 0xf60   :  { %4066 = vmatmul.mubr.msk.f32.vlgmr.msra.gmra.mxu1 %vm365_vm5, %v1950_v14 }
0x1020   :  { %v4067_v16 = vpop.f32.mrf.mxu1 }
0x1021   :  { %v4830_v6 = vadd.f32 %v4067_v16, %v3686_v15 }
0x1022   :  { %v2034_v63 = vpop.f32.mrf.mxu1 }
0x1023   :  { %v4832_v8 = vadd.f32 %v3686_v15, %v2034_v63  ;;  %2051 = vrot.lane.b32.xlu1 %v4830_v6, %s4396_s0 }
0x1025   :  { %2049 = vrot.lane.b32.xlu0 %v4832_v8, %s4396_s0  ;;  %4072 = vmatprep.mubr.msk.f32.mxu1 %vm183_vm1, %v4832_v8 }
0x1095   :  { %v2052_v17 = vpop.permute.xlu1 %2051 }
0x1096   :  { %4068 = vmatprep.subr.msk.mxu1 %vm183_vm1, %v2052_v17 }
0x1097   :  { %4069 = vmatpush3.xpose.msk.msra.mxu1 %vm183_vm1, %v2052_v17  ;;  %v2050_v18 = vpop.permute.xlu0 %2049  ;;  %v2043_v17 = vld [vmem:[%s5049_s30] sm:$0xff] }
0x1098   :  { %4070 = vmatprep.subr.msk.mxu1 %vm183_vm1, %v2050_v18 }
0x109b   :  { %4071 = vmatpush3.xpose.msk.msra.mxu1 %vm183_vm1, %v2050_v18 }
0x109e   :  { %4073 = vmatmul.mubr.msk.f32.vlgmr.msra.gmra.mxu1 %vm183_vm1, %v4830_v6 }
0x115e   :  { %v4074_v21 = vpop.f32.mrf.mxu1 }
0x115f   :  { %v2137_v22 = vmul.f32 0.35355338, %v4074_v21 }
0x1160   :  { %v2127_v23 = vpop.f32.mrf.mxu1 }
0x1161   :  { %v2136_v24 = vmul.f32 0.35355338, %v2127_v23  ;;  %v2139_v27 = vsel %vm4656_vm12, %v2137_v22, -1e+30 }
0x1162   :  { %v2143_v28 = vsel %vm598_vm13, %v2139_v27, -inf }
0x1163   :  { %2144 = vmax.xlane.f32.xlu0 %v2143_v28  ;;  %v2138_v29 = vsel %vm4660_vm14, %v2136_v24, -1e+30 }
0x1164   :  { %v2140_v30 = vsel %vm598_vm13, %v2138_v29, -inf }
0x1165   :  { %2141 = vmax.xlane.f32.xlu1 %v2140_v30 }
0x1176   :  { %2164 = vrot.lane.b32.xlu1 %v4830_v6, %s4399_s13 }
0x117a   :  { %2255 = vrot.lane.b32.xlu1 %v4830_v6, %s4398_s9 }
0x117e   :  { %2253 = vrot.lane.b32.xlu1 %v4832_v8, %s4398_s9 }
0x11ec   :  { %v2145_v31 = vpop.xlane.xlu0 %2144 }
0x11ed   :  { %v2147_v32 = vsub.f32 %v2139_v27, %v2145_v31 }
0x11ee   :  { %v2142_v33 = vpop.xlane.xlu1 %2141 }
0x11ef   :  { %v2150_v34 = vmul.f32 1.442695, %v2147_v32  ;;  %v2146_v20 = vsub.f32 %v2138_v29, %v2142_v33 }
0x11f1   :  { %4297 = vpow2.f32 %v2150_v34  ;;  %v2148_v36 = vmul.f32 1.442695, %v2146_v20 }
0x11f2   :  { %v2165_v37 = vpop.permute.xlu1 %2164 }
0x11f3   :  { %4299 = vpow2.f32 %v2148_v36  ;;  %4075 = vmatprep.subr.mxu1 %v2165_v37 }
0x11f4   :  { %4076 = vmatpush3.msra.mxu1 %v2165_v37 }
0x11f6   :  { %v2256_v25 = vpop.permute.xlu1 %2255 }
0x11fa   :  { %v2254_v42 = vpop.permute.xlu1 %2253 }
0x11fe   :  { %v4298_v38 = vpop.eup %4297 }
0x11ff   :  { %v2155_v26 = vsel %vm598_vm13, %v4298_v38, 0.0 }
0x1200   :  { %v4300_v39 = vpop.eup %4299  ;;  %2156 = vadd.xlane.f32.xlu0 %v2155_v26 }
0x1201   :  { %v2152_v40 = vsel %vm598_vm13, %v4300_v39, 0.0 }
0x1202   :  { %2153 = vadd.xlane.f32.xlu1 %v2152_v40 }
0x1213   :  { %2251 = vrot.lane.b32.xlu1 %v4830_v6, %s4397_s5 }
0x1216   :  { %2162 = vrot.lane.b32.xlu0 %v4832_v8, %s4399_s13 }
0x121a   :  { %2249 = vrot.lane.b32.xlu0 %v4832_v8, %s4397_s5 }
0x1289   :  { %v2157_v44 = vpop.xlane.xlu0 %2156 }
0x128a   :  { %4301 = vrcp.f32 %v2157_v44 }
0x128b   :  { %v2154_v45 = vpop.xlane.xlu1 %2153 }
0x128c   :  { %4303 = vrcp.f32 %v2154_v45 }
0x128d   :  { %v2163_v46 = vpop.permute.xlu0 %2162 }
0x128e   :  { %4077 = vmatprep.subr.mxu1 %v2163_v46 }
0x128f   :  { %4078 = vmatpush3.msra.mxu1 %v2163_v46  ;;  %v2252_v50 = vpop.permute.xlu1 %2251 }
0x1290   :  { %4082 = vmatprep.subr.msk.mxu1 %vm183_vm1, %v2256_v25 }
0x1291   :  { %v2250_v49 = vpop.permute.xlu0 %2249 }
0x1297   :  { %v4302_v35 = vpop.eup %4301 }
0x1298   :  { %v2161_v19 = vmul.f32 %v4302_v35, %v4298_v38 }
0x1299   :  { %v4304_v47 = vpop.eup %4303 }
0x129a   :  { %v2160_v48 = vmul.f32 %v4304_v47, %v4300_v39 }
0x129c   :  { %4079 = vmatprep.mubr.msk.f32.mxu1 %vm598_vm13, %v2160_v48 }
0x129d   :  { %4080 = vmatmul.mubr.msk.f32.vlgmr.msra.gmra.mxu1 %vm598_vm13, %v2161_v19 }
0x129e   :  { %4083 = vmatpush3.xpose.msk.msra.mxu1 %vm183_vm1, %v2256_v25  ;;  %4086 = vmatprep.mubr.msk.f32.mxu1 %vm183_vm1, %v2250_v49 }
0x129f   :  { %4084 = vmatprep.subr.msk.mxu1 %vm183_vm1, %v2254_v42 }
0x12a2   :  { %4085 = vmatpush3.xpose.msk.msra.mxu1 %vm183_vm1, %v2254_v42 }
0x12a3   :  { %4096 = vmatprep.subr.mxu1 %v2044_v62 }
0x12a5   :  { %4087 = vmatmul.mubr.msk.f32.vlgmr.msra.gmra.mxu1 %vm183_vm1, %v2252_v50 }
0x12a6   :  { %4097 = vmatpush3.msra.mxu1 %v2044_v62 }
0x135d   :  { %v4081_v51 = vpop.f32.mrf.mxu1 }
0x135f   :  { %v2240_v52 = vpop.f32.mrf.mxu1 }
0x1365   :  { %v4088_v53 = vpop.f32.mrf.mxu1 }
0x1366   :  { %v2341_v54 = vmul.f32 0.35355338, %v4088_v53 }
0x1367   :  { %v2331_v55 = vpop.f32.mrf.mxu1 }
0x1368   :  { %v2340_v56 = vmul.f32 0.35355338, %v2331_v55  ;;  %v2343_v57 = vsel %vm4656_vm12, %v2341_v54, -1e+30 }
0x1369   :  { %v2347_v58 = vsel %vm598_vm13, %v2343_v57, -inf }
0x136a   :  { %2348 = vmax.xlane.f32.xlu1 %v2347_v58  ;;  %v2342_v59 = vsel %vm4660_vm14, %v2340_v56, -1e+30 }
0x136b   :  { %v2344_v60 = vsel %vm598_vm13, %v2342_v59, -inf }
0x136c   :  { %2345 = vmax.xlane.f32.xlu0 %v2344_v60 }
0x137b   :  { %2368 = vrot.lane.b32.xlu1 %v4830_v6, %s4400_s17 }
0x137f   :  { %2621 = vrot.lane.b32.xlu1 %v4830_v6, %s4401_s21 }
0x1383   :  { %2619 = vrot.lane.b32.xlu1 %v4832_v8, %s4401_s21 }
0x1387   :  { %2617 = vrot.lane.b32.xlu1 %v4830_v6, %s4402_s25 }
0x138b   :  { %2906 = vrot.lane.b32.xlu1 %v4832_v8, %s4403_s29 }
0x138f   :  { %2904 = vrot.lane.b32.xlu1 %v4830_v6, %s4404_s22 }
0x13f3   :  { %v2349_v0 = vpop.xlane.xlu1 %2348 }
0x13f4   :  { %v2351_v1 = vsub.f32 %v2343_v57, %v2349_v0 }
0x13f5   :  { %v2346_v61 = vpop.xlane.xlu0 %2345 }
0x13f6   :  { %v2354_v2 = vmul.f32 1.442695, %v2351_v1  ;;  %v2350_v3 = vsub.f32 %v2342_v59, %v2346_v61 }
0x13f7   :  { %v2369_v4 = vpop.permute.xlu1 %2368 }
0x13f8   :  { %4305 = vpow2.f32 %v2354_v2  ;;  %v2352_v5 = vmul.f32 1.442695, %v2350_v3  ;;  %4089 = vmatprep.subr.mxu0 %v2369_v4 }
0x13f9   :  { %4090 = vmatpush3.msra.mxu0 %v2369_v4 }
0x13fa   :  { %4307 = vpow2.f32 %v2352_v5 }
0x13fb   :  { %v2622_v7 = vpop.permute.xlu1 %2621 }
0x13fc   :  { %4106 = vmatprep.subr.msk.mxu1 %vm183_vm1, %v2622_v7 }
0x13ff   :  { %v2620_v28 = vpop.permute.xlu1 %2619 }
0x1403   :  { %v2618_v31 = vpop.permute.xlu1 %2617 }
0x1405   :  { %v4306_v10 = vpop.eup %4305 }
0x1406   :  { %v2359_v11 = vsel %vm598_vm13, %v4306_v10, 0.0 }
0x1407   :  { %v4308_v13 = vpop.eup %4307  ;;  %2360 = vadd.xlane.f32.xlu0 %v2359_v11  ;;  %v2907_v33 = vpop.permute.xlu1 %2906 }
0x1408   :  { %v2356_v14 = vsel %vm598_vm13, %v4308_v13, 0.0 }
0x140b   :  { %2357 = vadd.xlane.f32.xlu0 %v2356_v14  ;;  %v2905_v34 = vpop.permute.xlu1 %2904 }
0x1421   :  { %2366 = vrot.lane.b32.xlu0 %v4832_v8, %s4400_s17 }
0x1425   :  { %2615 = vrot.lane.b32.xlu0 %v4832_v8, %s4402_s25 }
0x1429   :  { %2908 = vrot.lane.b32.xlu0 %v4830_v6, %s4403_s29 }
0x142d   :  { %2902 = vrot.lane.b32.xlu0 %v4832_v8, %s4404_s22 }
0x1490   :  { %v2361_v15 = vpop.xlane.xlu0 %2360 }
0x1491   :  { %4309 = vrcp.f32 %v2361_v15 }
0x1494   :  { %v2358_v16 = vpop.xlane.xlu0 %2357 }
0x1495   :  { %4311 = vrcp.f32 %v2358_v16 }
0x1498   :  { %v2367_v63 = vpop.permute.xlu0 %2366 }
0x1499   :  { %4091 = vmatprep.subr.mxu0 %v2367_v63 }
0x149a   :  { %4092 = vmatpush3.msra.mxu0 %v2367_v63 }
0x149b   :  { %4101 = vmatprep.subr.mxu0 %v2043_v17 }
0x149c   :  { %v2616_v24 = vpop.permute.xlu0 %2615 }
0x149e   :  { %v4310_v18 = vpop.eup %4309 }
0x149f   :  { %v2365_v23 = vmul.f32 %v4310_v18, %v4306_v10 }
0x14a0   :  { %v2909_v30 = vpop.permute.xlu0 %2908 }
0x14a2   :  { %v4312_v21 = vpop.eup %4311 }
0x14a3   :  { %v2364_v22 = vmul.f32 %v4312_v21, %v4308_v13 }
0x14a4   :  { %v2903_v32 = vpop.permute.xlu0 %2902 }
0x14a5   :  { %4093 = vmatprep.mubr.msk.f32.mxu0 %vm598_vm13, %v2364_v22 }
0x14a6   :  { %4094 = vmatmul.mubr.msk.f32.vlgmr.msra.gmra.mxu0 %vm598_vm13, %v2365_v23 }
0x14a7   :  { %4103 = vmatprep.mubr.msk.f32.mxu0 %vm183_vm1, %v2240_v52  ;;  %4102 = vmatpush3.msra.mxu0 %v2043_v17 }
0x14aa   :  { %4104 = vmatmul.mubr.msk.f32.vlgmr.msra.gmra.mxu0 %vm183_vm1, %v4081_v51 }
0x1566   :  { %v4095_v27 = vpop.f32.mrf.mxu0 }
0x1568   :  { %v2444_v29 = vpop.f32.mrf.mxu0 }
0x1569   :  { %4098 = vmatprep.mubr.msk.f32.mxu1 %vm183_vm1, %v2444_v29 }
0x156a   :  { %4099 = vmatmul.mubr.msk.f32.vlgmr.msra.gmra.mxu1 %vm183_vm1, %v4095_v27  ;;  %v4105_v21 = vpop.f32.mrf.mxu0 }
0x156b   :  { %4107 = vmatpush3.xpose.msk.msra.mxu1 %vm183_vm1, %v2622_v7  ;;  %4110 = vmatprep.mubr.msk.f32.mxu1 %vm183_vm1, %v2616_v24  ;;  %v2045_v7 = vld [vmem:[%s5049_s30 + $0x10] sm:$0xff] }
0x156c   :  { %4108 = vmatprep.subr.msk.mxu1 %vm183_vm1, %v2620_v28  ;;  %v2606_v22 = vpop.f32.mrf.mxu0 }
0x156f   :  { %4109 = vmatpush3.xpose.msk.msra.mxu1 %vm183_vm1, %v2620_v28 }
0x1570   :  { %4125 = vmatprep.subr.msk.mxu1 %vm183_vm1, %v2909_v30 }
0x1572   :  { %4111 = vmatmul.mubr.msk.f32.vlgmr.msra.gmra.mxu1 %vm183_vm1, %v2618_v31 }
0x1573   :  { %4126 = vmatpush3.xpose.msk.msra.mxu1 %vm183_vm1, %v2909_v30  ;;  %4129 = vmatprep.mubr.msk.f32.mxu1 %vm183_vm1, %v2903_v32  ;;  %v2046_v32 = vld [vmem:[%s5049_s30 + $0x18] sm:$0xff] }
0x1574   :  { %4127 = vmatprep.subr.msk.mxu1 %vm183_vm1, %v2907_v33 }
0x1577   :  { %4128 = vmatpush3.xpose.msk.msra.mxu1 %vm183_vm1, %v2907_v33 }
0x157a   :  { %4130 = vmatmul.mubr.msk.f32.vlgmr.msra.gmra.mxu1 %vm183_vm1, %v2905_v34 }
0x162a   :  { %v4922_v20 = vpop.f32.mrf.mxu1 }
0x162b   :  { %v2612_v33 = vadd.f32 %v4105_v21, %v4922_v20  ;;  %v3357_v21 = vld [vmem:[%s5052_s1 + $0x58] sm:$0xff] }
0x162c   :  { %v4924_v36 = vpop.f32.mrf.mxu1 }
0x1632   :  { %v4112_v37 = vpop.f32.mrf.mxu1 }
0x1633   :  { %v2707_v38 = vmul.f32 0.35355338, %v4112_v37  ;;  %v2607_v37 = vadd.f32 %v2606_v22, %v4924_v36  ;;  %v3356_v22 = vld [vmem:[%s5052_s1 + $0x50] sm:$0xff] }
0x1634   :  { %v2697_v26 = vpop.f32.mrf.mxu1 }
0x1635   :  { %v2706_v39 = vmul.f32 0.35355338, %v2697_v26  ;;  %v2709_v40 = vsel %vm4656_vm12, %v2707_v38, -1e+30 }
0x1636   :  { %v2713_v25 = vsel %vm598_vm13, %v2709_v40, -inf }
0x1637   :  { %2714 = vmax.xlane.f32.xlu1 %v2713_v25  ;;  %v2708_v42 = vsel %vm4660_vm14, %v2706_v39, -1e+30 }
0x1638   :  { %v2710_v44 = vsel %vm598_vm13, %v2708_v42, -inf }
0x1639   :  { %2711 = vmax.xlane.f32.xlu0 %v2710_v44 }
0x163a   :  { %v4131_v45 = vpop.f32.mrf.mxu1 }
0x163b   :  { %v2994_v62 = vmul.f32 0.35355338, %v4131_v45  ;;  %v3721_v45 = vld [vmem:[%s5050_s6] ss:$0 sm:$0xff] }
0x163c   :  { %v2984_v46 = vpop.f32.mrf.mxu1 }
0x163d   :  { %v2993_v35 = vmul.f32 0.35355338, %v2984_v46  ;;  %v2996_v61 = vsel %vm4656_vm12, %v2994_v62, -1e+30  ;;  %v3361_v62 = vld [vmem:[%s5052_s1 + $0x78] sm:$0xff] }
0x163e   :  { %v3000_v2 = vsel %vm598_vm13, %v2996_v61, -inf }
0x163f   :  { %v2995_v47 = vsel %vm4660_vm14, %v2993_v35, -1e+30 }
0x1640   :  { %v2997_v48 = vsel %vm598_vm13, %v2995_v47, -inf }
0x1648   :  { %2734 = vrot.lane.b32.xlu1 %v4830_v6, %s4405_s23 }
0x166c   :  { %2998 = vmax.xlane.f32.xlu1 %v2997_v48 }
0x16c0   :  { %v2715_v19 = vpop.xlane.xlu1 %2714 }
0x16c1   :  { %v2717_v49 = vsub.f32 %v2709_v40, %v2715_v19 }
0x16c2   :  { %v2712_v50 = vpop.xlane.xlu0 %2711 }
0x16c3   :  { %v2720_v51 = vmul.f32 1.442695, %v2717_v49  ;;  %v2716_v52 = vsub.f32 %v2708_v42, %v2712_v50 }
0x16c4   :  { %v2735_v53 = vpop.permute.xlu1 %2734 }
0x16c5   :  { %4313 = vpow2.f32 %v2720_v51  ;;  %v2718_v54 = vmul.f32 1.442695, %v2716_v52  ;;  %4113 = vmatprep.subr.mxu0 %v2735_v53 }
0x16c6   :  { %4114 = vmatpush3.msra.mxu0 %v2735_v53 }
0x16c7   :  { %4315 = vpow2.f32 %v2718_v54 }
0x16d2   :  { %v4314_v55 = vpop.eup %4313 }
0x16d3   :  { %v2725_v56 = vsel %vm598_vm13, %v4314_v55, 0.0 }
0x16d4   :  { %v4316_v57 = vpop.eup %4315  ;;  %2726 = vadd.xlane.f32.xlu0 %v2725_v56 }
0x16d5   :  { %v2722_v12 = vsel %vm598_vm13, %v4316_v57, 0.0 }
0x16d8   :  { %2723 = vadd.xlane.f32.xlu0 %v2722_v12  ;;  %v3247_v12 = vld [vmem:[%s5051_s28 + $0x18] sm:$0xff] }
0x16d9   :  { %4144 = vmatprep.subr.mxu1 %v3247_v12 }
0x16da   :  { %4145 = vmatpush3.msra.mxu1 %v3247_v12 }
0x16ee   :  { %2732 = vrot.lane.b32.xlu0 %v4832_v8, %s4405_s23 }
0x16f5   :  { %v2999_v58 = vpop.xlane.xlu1 %2998 }
0x16f6   :  { %v3003_v59 = vsub.f32 %v2995_v47, %v2999_v58  ;;  %v3246_v58 = vld [vmem:[%s5051_s28 + $0x10] sm:$0xff] }
0x16f7   :  { %4146 = vmatprep.subr.mxu1 %v3246_v58 }
0x16f8   :  { %v3005_v60 = vmul.f32 1.442695, %v3003_v59  ;;  %v3245_v59 = vld [vmem:[%s5051_s28 + $0x8] sm:$0xff]  ;;  %4147 = vmatpush3.msra.mxu1 %v3246_v58 }
0x16f9   :  { %4148 = vmatprep.subr.mxu1 %v3245_v59 }
0x16fa   :  { %4317 = vpow2.f32 %v3005_v60  ;;  %v3244_v60 = vld [vmem:[%s5051_s28] sm:$0xff]  ;;  %4149 = vmatpush3.msra.mxu1 %v3245_v59 }
0x16fb   :  { %4150 = vmatprep.subr.mxu1 %v3244_v60 }
0x16fc   :  { %4151 = vmatpush3.msra.mxu1 %v3244_v60 }
0x1707   :  { %v4318_v0 = vpop.eup %4317 }
0x1708   :  { %v3009_v1 = vsel %vm598_vm13, %v4318_v0, 0.0 }
0x1709   :  { %3010 = vadd.xlane.f32.xlu1 %v3009_v1  ;;  %v3359_v1 = vld [vmem:[%s5052_s1 + $0x68] sm:$0xff] }
0x170d   :  { %3001 = vmax.xlane.f32.xlu0 %v3000_v2 }
0x171a   :  { %3021 = vrot.lane.b32.xlu1 %v4830_v6, %s4406_s26 }
0x175d   :  { %v2727_v3 = vpop.xlane.xlu0 %2726 }
0x175e   :  { %4319 = vrcp.f32 %v2727_v3 }
0x1761   :  { %v2724_v4 = vpop.xlane.xlu0 %2723 }
0x1762   :  { %4321 = vrcp.f32 %v2724_v4 }
0x1765   :  { %v2733_v5 = vpop.permute.xlu0 %2732 }
0x1766   :  { %4115 = vmatprep.subr.mxu0 %v2733_v5 }
0x1767   :  { %4116 = vmatpush3.msra.mxu0 %v2733_v5 }
0x1768   :  { %4120 = vmatprep.subr.mxu0 %v2045_v7 }
0x176b   :  { %v4320_v10 = vpop.eup %4319 }
0x176c   :  { %v2731_v9 = vmul.f32 %v4320_v10, %v4314_v55 }
0x176f   :  { %v4322_v11 = vpop.eup %4321 }
0x1770   :  { %v2730_v13 = vmul.f32 %v4322_v11, %v4316_v57  ;;  %v3722_v11 = vld [vmem:[%s5053_s2] ss:$0 sm:$0xff] }
0x1772   :  { %4117 = vmatprep.mubr.msk.f32.mxu0 %vm598_vm13, %v2730_v13 }
0x1773   :  { %4118 = vmatmul.mubr.msk.f32.vlgmr.msra.gmra.mxu0 %vm598_vm13, %v2731_v9 }
0x1774   :  { %4121 = vmatpush3.msra.mxu0 %v2045_v7 }
0x1792   :  { %v3011_v14 = vpop.xlane.xlu1 %3010 }
0x1796   :  { %v3022_v6 = vpop.permute.xlu1 %3021  ;;  %v3002_v15 = vpop.xlane.xlu0 %3001 }
0x1797   :  { %v3004_v16 = vsub.f32 %v2996_v61, %v3002_v15  ;;  %4132 = vmatprep.subr.mxu0 %v3022_v6  ;;  %v3723_v15 = vld [vmem:[%s5054_s7] ss:$0 sm:$0xff] }
0x1799   :  { %v3007_v63 = vmul.f32 1.442695, %v3004_v16 }
0x179b   :  { %4323 = vpow2.f32 %v3007_v63 }
0x179c   :  { %4325 = vrcp.f32 %v3011_v14 }
0x17a8   :  { %v4324_v17 = vpop.eup %4323 }
0x17a9   :  { %v3012_v18 = vsel %vm598_vm13, %v4324_v17, 0.0  ;;  %v4326_v23 = vpop.eup %4325 }
0x17aa   :  { %3013 = vadd.xlane.f32.xlu0 %v3012_v18  ;;  %v3017_v29 = vmul.f32 %v4326_v23, %v4318_v0  ;;  %v3360_v0 = vld [vmem:[%s5052_s1 + $0x70] sm:$0xff]  ;;  %v3358_v18 = vld [vmem:[%s5052_s1 + $0x60] sm:$0xff]  ;;  %v3355_v23 = vld [vmem:[%s5052_s1 + $0x48] sm:$0xff] }
0x17c0   :  { %3019 = vrot.lane.b32.xlu0 %v4832_v8, %s4406_s26 }
0x1833   :  { %v4119_v24 = vpop.f32.mrf.mxu0  ;;  %v3014_v27 = vpop.xlane.xlu0 %3013 }
0x1834   :  { %4327 = vrcp.f32 %v3014_v27  ;;  %v3353_v27 = vld [vmem:[%s5052_s1 + $0x38] sm:$0xff] }
0x1835   :  { %v2810_v28 = vpop.f32.mrf.mxu0 }
0x1836   :  { %4122 = vmatprep.mubr.msk.f32.mxu0 %vm183_vm1, %v2810_v28  ;;  %v3352_v28 = vld [vmem:[%s5052_s1 + $0x30] sm:$0xff] }
0x1837   :  { %4123 = vmatmul.mubr.msk.f32.vlgmr.msra.gmra.mxu0 %vm183_vm1, %v4119_v24  ;;  %v3020_v30 = vpop.permute.xlu0 %3019  ;;  %v3354_v24 = vld [vmem:[%s5052_s1 + $0x40] sm:$0xff] }
0x1838   :  { %4133 = vmatpush3.msra.mxu0 %v3022_v6  ;;  %4136 = vmatprep.mubr.msk.f32.mxu0 %vm598_vm13, %v3017_v29  ;;  %v3351_v29 = vld [vmem:[%s5052_s1 + $0x28] sm:$0xff] }
0x1839   :  { %4134 = vmatprep.subr.mxu0 %v3020_v30 }
0x183a   :  { %4135 = vmatpush3.msra.mxu0 %v3020_v30  ;;  %v3350_v30 = vld [vmem:[%s5052_s1 + $0x20] sm:$0xff] }
0x183b   :  { %4139 = vmatprep.subr.mxu0 %v2046_v32 }
0x1841   :  { %v4328_v8 = vpop.eup %4327 }
0x1842   :  { %v3018_v31 = vmul.f32 %v4328_v8, %v4324_v17  ;;  %v3349_v8 = vld [vmem:[%s5052_s1 + $0x18] sm:$0xff] }
0x1844   :  { %4137 = vmatmul.mubr.msk.f32.vlgmr.msra.gmra.mxu0 %vm598_vm13, %v3018_v31  ;;  %v3348_v31 = vld [vmem:[%s5052_s1 + $0x10] sm:$0xff] }
0x1845   :  { %4140 = vmatpush3.msra.mxu0 %v2046_v32  ;;  %v3347_v32 = vld [vmem:[%s5052_s1 + $0x8] sm:$0xff] }
0x1846   :  { %4155 = vmatprep.subr.mxu0 %v3361_v62 }
0x18f7   :  { %v4124_v34 = vpop.f32.mrf.mxu0 }
0x18f8   :  { %v2901_v38 = vadd.f32 %v4124_v34, %v2612_v33  ;;  %v3346_v33 = vld [vmem:[%s5052_s1] sm:$0xff] }
0x18f9   :  { %v2891_v26 = vpop.f32.mrf.mxu0  ;;  %v3724_v34 = vld [vmem:[%s5055_s10] ss:$0 sm:$0xff] }
0x18fa   :  { %v2900_v39 = vadd.f32 %v2891_v26, %v2607_v37 }
0x1904   :  { %v4138_v40 = vpop.f32.mrf.mxu0 }
0x1906   :  { %v3097_v25 = vpop.f32.mrf.mxu0 }
0x1907   :  { %4141 = vmatprep.mubr.msk.f32.mxu0 %vm183_vm1, %v3097_v25 }
0x1908   :  { %4142 = vmatmul.mubr.msk.f32.vlgmr.msra.gmra.mxu0 %vm183_vm1, %v4138_v40 }
0x1909   :  { %4156 = vmatpush3.msra.mxu0 %v3361_v62 }
0x190a   :  { %4157 = vmatprep.subr.mxu0 %v3360_v0 }
0x190b   :  { %4158 = vmatpush3.msra.mxu0 %v3360_v0 }
0x190c   :  { %4159 = vmatprep.subr.mxu0 %v3359_v1 }
0x190d   :  { %4160 = vmatpush3.msra.mxu0 %v3359_v1  ;;  %v3495_v1 = vld [vmem:[%s4563_s4 + $0x18] sm:$0xff] }
0x190e   :  { %4161 = vmatprep.subr.mxu0 %v3358_v18  ;;  %4190 = vmatprep.subr.mxu1 %v3495_v1 }
0x190f   :  { %4162 = vmatpush3.msra.mxu0 %v3358_v18 }
0x1910   :  { %4163 = vmatprep.subr.mxu0 %v3357_v21 }
0x1911   :  { %4164 = vmatpush3.msra.mxu0 %v3357_v21 }
0x1912   :  { %4165 = vmatprep.subr.mxu0 %v3356_v22 }
0x1913   :  { %4166 = vmatpush3.msra.mxu0 %v3356_v22 }
0x1914   :  { %4167 = vmatprep.subr.mxu0 %v3355_v23 }
0x1915   :  { %4168 = vmatpush3.msra.mxu0 %v3355_v23  ;;  %v3730_v23 = vld [vmem:[%s4568_s12] ss:$0 sm:$0xff] }
0x1916   :  { %4169 = vmatprep.subr.mxu0 %v3354_v24 }
0x1917   :  { %4170 = vmatpush3.msra.mxu0 %v3354_v24 }
0x1918   :  { %4171 = vmatprep.subr.mxu0 %v3353_v27 }
0x1919   :  { %4172 = vmatpush3.msra.mxu0 %v3353_v27 }
0x191a   :  { %4173 = vmatprep.subr.mxu0 %v3352_v28 }
0x191b   :  { %4174 = vmatpush3.msra.mxu0 %v3352_v28 }
0x191c   :  { %4175 = vmatprep.subr.mxu0 %v3351_v29 }
0x191d   :  { %4176 = vmatpush3.msra.mxu0 %v3351_v29 }
0x191e   :  { %4177 = vmatprep.subr.mxu0 %v3350_v30 }
0x191f   :  { %4178 = vmatpush3.msra.mxu0 %v3350_v30 }
0x1920   :  { %4179 = vmatprep.subr.mxu0 %v3349_v8 }
0x1921   :  { %4180 = vmatpush3.msra.mxu0 %v3349_v8 }
0x1922   :  { %4181 = vmatprep.subr.mxu0 %v3348_v31 }
0x1923   :  { %4182 = vmatpush3.msra.mxu0 %v3348_v31 }
0x1924   :  { %4183 = vmatprep.subr.mxu0 %v3347_v32 }
0x1925   :  { %4184 = vmatpush3.msra.mxu0 %v3347_v32 }
0x1926   :  { %4185 = vmatprep.subr.mxu0 %v3346_v33 }
0x1927   :  { %4186 = vmatpush3.msra.mxu0 %v3346_v33 }
0x19c8   :  { %v4143_v42 = vpop.f32.mrf.mxu0 }
0x19c9   :  { %v3188_v44 = vadd.f32 %v4143_v42, %v2901_v38 }
0x19ca   :  { %v3178_v46 = vpop.f32.mrf.mxu0 }
0x19cb   :  { %v3190_v35 = vadd.f32 %v3188_v44, %v4808_v41  ;;  %v3187_v47 = vadd.f32 %v3178_v46, %v2900_v39 }
0x19cd   :  { %v4964_v20 = vadd.f32 %v3721_v45, %v3190_v35  ;;  %v3189_v36 = vadd.f32 %v3187_v47, %v4811_v43 }
0x19cf   :  { %v4967_v48 = vadd.f32 %v3721_v45, %v3189_v36  ;;  %v3205_v19 = vsel %vm365_vm5, %v4964_v20, 0.0 }
0x19d0   :  { %3206 = vadd.xlane.f32.xlu0 %v3205_v19 }
0x19d1   :  { %v3202_v49 = vsel %vm365_vm5, %v4967_v48, 0.0 }
0x19d2   :  { %3203 = vadd.xlane.f32.xlu1 %v3202_v49 }
0x1a59   :  { %v3207_v50 = vpop.xlane.xlu0 %3206 }
0x1a5a   :  { %v3209_v41 = vmul.f32 0.03125, %v3207_v50  ;;  %v3727_v50 = vld [vmem:[%s5056_s11] ss:$0 sm:$0xff] }
0x1a5b   :  { %v3204_v51 = vpop.xlane.xlu1 %3203 }
0x1a5c   :  { %v3211_v52 = vsub.f32 %v4964_v20, %v3209_v41  ;;  %v3208_v43 = vmul.f32 0.03125, %v3204_v51 }
0x1a5e   :  { %v3210_v53 = vsub.f32 %v4967_v48, %v3208_v43  ;;  %v3213_v54 = vmul.f32 %v3211_v52, %v3211_v52 }
0x1a60   :  { %v3217_v55 = vsel %vm365_vm5, %v3213_v54, 0.0  ;;  %v3212_v56 = vmul.f32 %v3210_v53, %v3210_v53 }
0x1a61   :  { %3218 = vadd.xlane.f32.xlu0 %v3217_v55 }
0x1a62   :  { %v3214_v57 = vsel %vm365_vm5, %v3212_v56, 0.0 }
0x1a63   :  { %3215 = vadd.xlane.f32.xlu1 %v3214_v57 }
0x1aea   :  { %v3219_v61 = vpop.xlane.xlu0 %3218 }
0x1aeb   :  { %v3221_v2 = vmul.f32 0.03125, %v3219_v61  ;;  %v3494_v61 = vld [vmem:[%s4563_s4 + $0x10] sm:$0xff] }
0x1aec   :  { %v3216_v3 = vpop.xlane.xlu1 %3215 }
0x1aed   :  { %v3223_v4 = vadd.f32 1e-05, %v3221_v2  ;;  %v3220_v5 = vmul.f32 0.03125, %v3216_v3  ;;  %v3493_v2 = vld [vmem:[%s4563_s4 + $0x8] sm:$0xff]  ;;  %v3492_v3 = vld [vmem:[%s4563_s4] sm:$0xff]  ;;  %s4407_s4 = smov [#allocation2]  }
0x1aee   :  { %s3591_s16 = sshll.u32 %s4407_s4, 4  ;;  %s3592_s16 = int_to_ptr.vmem [resolvable:$true] %s3591_s16 }
0x1aef   :  { %4329 = vrsqrt.f32 %v3223_v4  ;;  %v3222_v7 = vadd.f32 1e-05, %v3220_v5  ;;  %p4346_p1 = scmp.lt.s32.totalorder %s3592_s16, %s3592_s16 }
0x1af1   :  { %4331 = vrsqrt.f32 %v3222_v7 }
0x1afc   :  { %v4330_v10 = vpop.eup %4329 }
0x1afd   :  { %v3227_v13 = vmul.f32 %v4330_v10, %v3211_v52 }
0x1afe   :  { %v4332_v9 = vpop.eup %4331 }
0x1aff   :  { %v3226_v14 = vmul.f32 %v4332_v9, %v3210_v53  ;;  %v3235_v6 = vmul.f32 %v3722_v11, %v3227_v13 }
0x1b01   :  { %v3234_v16 = vmul.f32 %v3722_v11, %v3226_v14  ;;  %v3243_v17 = vadd.f32 %v3723_v15, %v3235_v6  ;;  %v3728_v14 = vld [vmem:[%s5057_s15] ss:$0 sm:$0xff] }
0x1b03   :  { %v3242_v63 = vadd.f32 %v3723_v15, %v3234_v16 }
0x1b05   :  { %4152 = vmatprep.mubr.msk.f32.mxu1 %vm365_vm5, %v3242_v63 }
0x1b06   :  { %4153 = vmatmul.mubr.msk.f32.vlgmr.msra.gmra.mxu1 %vm365_vm5, %v3243_v17  ;;  %v3729_v17 = vld [vmem:[%s4558_s27] ss:$0 sm:$0xff]  ;;  %s4341_s27 = scalar_lea.vmem %s3592_s16, 256 }
0x1b07   :  { %4191 = vmatpush3.msra.mxu1 %v3495_v1  ;;  %p4342_p0 = scmp.ne.s32.totalorder %s3592_s16, %s4341_s27  ;;  %p4347_p2 = scmp.lt.s32.totalorder %s4341_s27, %s4341_s27 }
0x1b08   :  { %4192 = vmatprep.subr.mxu1 %v3494_v61 }
0x1b09   :  { %4193 = vmatpush3.msra.mxu1 %v3494_v61  ;;  %p4348_p3 = por %p4347_p2, %p4346_p1 }
0x1b0a   :  { %4194 = vmatprep.subr.mxu1 %v3493_v2 }
0x1b0b   :  { %4195 = vmatpush3.msra.mxu1 %v3493_v2  ;;  %p4349_p4 = pnand %p4348_p3, %p4342_p0 }
0x1b0c   :  { %4196 = vmatprep.subr.mxu1 %v3492_v3 }
0x1b0d   :  { %4197 = vmatpush3.msra.mxu1 %v3492_v3 }
0x1bc6   :  { %v4154_v37 = vpop.f32.mrf.mxu1 }
0x1bc7   :  { %v3333_v38 = vadd.f32 %v4154_v37, %v3724_v34 }
0x1bc8   :  { %v3327_v26 = vpop.f32.mrf.mxu1 }
0x1bc9   :  { %v3339_v39 = vmul.f32 0.70710677, %v3333_v38  ;;  %v3328_v40 = vadd.f32 %v3724_v34, %v3327_v26  ;;  %v3337_v47 = vmul.f32 0.5, %v3333_v38 }
0x1bcb   :  { %4333 = verf.f32 %v3339_v39  ;;  %v3338_v25 = vmul.f32 0.70710677, %v3328_v40  ;;  %v3336_v46 = vmul.f32 0.5, %v3328_v40 }
0x1bcd   :  { %4335 = verf.f32 %v3338_v25 }
0x1bd8   :  { %v4334_v42 = vpop.eup %4333 }
0x1bd9   :  { %v3343_v45 = vadd.f32 1.0, %v4334_v42 }
0x1bda   :  { %v4336_v44 = vpop.eup %4335 }
0x1bdb   :  { %v3342_v35 = vadd.f32 1.0, %v4336_v44  ;;  %v3345_v19 = vmul.f32 %v3343_v45, %v3337_v47 }
0x1bdd   :  { %v3344_v36 = vmul.f32 %v3342_v35, %v3336_v46 }
0x1bdf   :  { %4187 = vmatprep.mubr.f32.mxu0 %v3344_v36 }
0x1be0   :  { %4188 = vmatmul.mubr.f32.vlgmr.msra.gmra.mxu0 %v3345_v19 }
0x1ca0   :  { %v4189_v49 = vpop.f32.mrf.mxu0 }
0x1ca1   :  { %v3438_v41 = vadd.f32 %v4189_v49, %v4964_v20 }
0x1ca2   :  { %v3428_v51 = vpop.f32.mrf.mxu0 }
0x1ca3   :  { %v3437_v52 = vadd.f32 %v3428_v51, %v4967_v48  ;;  %v3447_v43 = vadd.f32 %v3727_v50, %v3438_v41 }
0x1ca5   :  { %v3446_v53 = vadd.f32 %v3727_v50, %v3437_v52  ;;  %v3453_v54 = vsel %vm365_vm5, %v3447_v43, 0.0 }
0x1ca6   :  { %3454 = vadd.xlane.f32.xlu0 %v3453_v54 }
0x1ca7   :  { %v3450_v55 = vsel %vm365_vm5, %v3446_v53, 0.0 }
0x1ca8   :  { %3451 = vadd.xlane.f32.xlu1 %v3450_v55 }
0x1d2f   :  { %v3455_v56 = vpop.xlane.xlu0 %3454 }
0x1d30   :  { %v3457_v57 = vmul.f32 0.03125, %v3455_v56 }
0x1d31   :  { %v3452_v12 = vpop.xlane.xlu1 %3451 }
0x1d32   :  { %v3459_v58 = vsub.f32 %v3447_v43, %v3457_v57  ;;  %v3456_v20 = vmul.f32 0.03125, %v3452_v12 }
0x1d34   :  { %v3458_v59 = vsub.f32 %v3446_v53, %v3456_v20  ;;  %v3461_v60 = vmul.f32 %v3459_v58, %v3459_v58 }
0x1d36   :  { %v3465_v48 = vsel %vm365_vm5, %v3461_v60, 0.0  ;;  %v3460_v62 = vmul.f32 %v3458_v59, %v3458_v59 }
0x1d37   :  { %3466 = vadd.xlane.f32.xlu0 %v3465_v48 }
0x1d38   :  { %v3462_v0 = vsel %vm365_vm5, %v3460_v62, 0.0 }
0x1d39   :  { %3463 = vadd.xlane.f32.xlu1 %v3462_v0 }
0x1dc0   :  { %v3467_v4 = vpop.xlane.xlu0 %3466 }
0x1dc1   :  { %v3469_v5 = vmul.f32 0.03125, %v3467_v4 }
0x1dc2   :  { %v3464_v7 = vpop.xlane.xlu1 %3463 }
0x1dc3   :  { %v3471_v10 = vadd.f32 1e-05, %v3469_v5  ;;  %v3468_v11 = vmul.f32 0.03125, %v3464_v7 }
0x1dc5   :  { %4337 = vrsqrt.f32 %v3471_v10  ;;  %v3470_v13 = vadd.f32 1e-05, %v3468_v11 }
0x1dc7   :  { %4339 = vrsqrt.f32 %v3470_v13 }
0x1dd2   :  { %v4338_v9 = vpop.eup %4337 }
0x1dd3   :  { %v3475_v6 = vmul.f32 %v4338_v9, %v3459_v58 }
0x1dd4   :  { %v4340_v15 = vpop.eup %4339 }
0x1dd5   :  { %v3474_v16 = vmul.f32 %v4340_v15, %v3458_v59  ;;  %v3483_v63 = vmul.f32 %v3728_v14, %v3475_v6 }
0x1dd7   :  { %v3482_v18 = vmul.f32 %v3728_v14, %v3474_v16  ;;  %v3491_v22 = vadd.f32 %v3729_v17, %v3483_v63 }
0x1dd9   :  { %v3490_v21 = vadd.f32 %v3729_v17, %v3482_v18 }
0x1ddb   :  { %4198 = vmatprep.mubr.msk.f32.mxu1 %vm365_vm5, %v3490_v21 }
0x1ddc   :  { %4199 = vmatmul.mubr.msk.f32.vlgmr.msra.gmra.mxu1 %vm365_vm5, %v3491_v22 }
0x1e9c   :  { %v4200_v24 = vpop.f32.mrf.mxu1 }
0x1e9d   :  { %v3581_v27 = vadd.f32 %v4200_v24, %v3730_v23 }
0x1e9e   :  { %v3575_v28 = vpop.f32.mrf.mxu1 }
0x1e9f   :  { %3585 = vst.msk [vmem:[#allocation2 + $0x8] sm:$0xff] %vm265_vm2, %v3581_v27  ;;  %v3576_v29 = vadd.f32 %v3730_v23, %v3575_v28 }
0x1ea1   :  { %3584 = vst.msk [vmem:[#allocation2] sm:$0xff] %vm265_vm2, %v3576_v29 }
0x1ea2   :  { %4352 = shalt.err (!%p4349_p4)
}
0x1ea3   :  { %s4408_s18 = smov 128   ;;  %s4409_s12 = smov 8  }
0x1ea4   :  { %3597 = dma.vmem_to_hbm [thread:$0]  %s3592_s16, 256, %s4573_s20, [#allocation3], %s4408_s18, %s4408_s18, %s4409_s12  }
0x1ea5   :  { %4361 = dma.done.wait [#allocation3], 256  }
0x1ea6   :  { %4362 = vsyncadd [#allocation3], 4294967040 }
0x1ea7   :  { %3601 = vsyncpa [#allocation3], 1 }

</bundles_post_ra>
